<compile_context>
chip_gen: v7x
topology: tpu7x:2x2x1
jax: 0.10.0
libtpu: 0.0.40
codegen_flags: <defaults>
</compile_context>

<pallas_src>
import math

import jax
import jax.numpy as jnp
from jax.experimental import pallas as pl
from jax.experimental.pallas import tpu as pltpu

SQRT2 = math.sqrt(2.0)  # reference: `x *= 2 ** 0.5` when res=True and rezero is None


def _round_up(a, m):
    return (a + m - 1) // m * m


def _vmem_capacity_bytes():
    try:
        return int(pltpu.get_tpu_info().vmem_capacity_bytes)
    except Exception:
        return None


def _choose_tiling(T, tile_cap=None):
    """Per-generation T tile + scoped-VMEM limit (128 MiB parts vs v7x's 64 MiB)."""
    vmem = _vmem_capacity_bytes()
    big = vmem is not None and vmem >= 100 * 1024 * 1024
    cap = tile_cap if tile_cap is not None else (1024 if big else 512)
    vmem_limit = (96 if big else 40) * 1024 * 1024
    tile = cap if T > cap else _round_up(max(T, 16), 16)
    return tile, vmem_limit


# ---------------------------------------------------------------------------
# Kernel 1: kernel-size-3, same-padding Conv1d over [B, T, C]
#           (used for `pre`, `post1` (+relu), `post2`); masks input & output rows.
#           Grid (B, nT), both parallel; K=3 halo rows assembled host-side per tile.
# ---------------------------------------------------------------------------
def conv1d_k3(x, w, b, lengths, tile_t, *, vmem_limit_bytes, relu=False,
              out_dtype=jnp.float32):
    """x: (B, T, Cin); w: (3, Cin, Cout) bf16; b: (1, Cout) f32; lengths: (B,) i32."""
    B, T, Cin = x.shape
    Cout = w.shape[-1]
    assert T % tile_t == 0
    nT = T // tile_t

    # per-tile halo rows x[ti*tile_t - 1] and x[(ti+1)*tile_t] (zeros at the boundaries),
    # then the (tile_t + 2)-row overlapped windows (pure pad/reshape/concat — no gather).
    lo = jnp.pad(x, ((0, 0), (1, 0), (0, 0)))[:, 0:T:tile_t].reshape(B, nT, 1, Cin)
    hi = jnp.pad(x, ((0, 0), (0, 1), (0, 0)))[:, tile_t::tile_t].reshape(B, nT, 1, Cin)
    xw = jnp.concatenate([lo, x.reshape(B, nT, tile_t, Cin), hi], axis=2)

    def kernel(lens_ref, xw_ref, w_ref, b_ref, o_ref):
        n = lens_ref[pl.program_id(0)]
        t0 = pl.program_id(1) * tile_t

        # input mask (== x.masked_fill(mask, 0)); halo rows at t=-1 / t=T are already 0.
        tpad = jax.lax.broadcasted_iota(jnp.int32, (tile_t + 2, 1), 0) - 1 + t0
        xp = xw_ref[...]
        xpb = (xp * (tpad < n).astype(xp.dtype)).astype(jnp.bfloat16)  # single cast

        wk = w_ref[...]
        acc = jnp.dot(xpb[0:tile_t], wk[0], preferred_element_type=jnp.float32)
        acc = acc + jnp.dot(xpb[1:tile_t + 1], wk[1], preferred_element_type=jnp.float32)
        acc = acc + jnp.dot(xpb[2:tile_t + 2], wk[2], preferred_element_type=jnp.float32)
        acc = acc + b_ref[...]
        if relu:
            acc = jnp.maximum(acc, 0.0)
        t = jax.lax.broadcasted_iota(jnp.int32, (tile_t, 1), 0) + t0
        o_ref[...] = (acc * (t < n).astype(jnp.float32)).astype(o_ref.dtype)

    grid_spec = pltpu.PrefetchScalarGridSpec(
        num_scalar_prefetch=1,
        grid=(B, nT),
        in_specs=[
            pl.BlockSpec((None, None, tile_t + 2, Cin),
                         lambda bi, ti, lens: (bi, ti, 0, 0)),
            pl.BlockSpec((3, Cin, Cout), lambda bi, ti, lens: (0, 0, 0)),  # resident
            pl.BlockSpec((1, Cout), lambda bi, ti, lens: (0, 0)),          # resident
        ],
        out_specs=pl.BlockSpec((None, tile_t, Cout), lambda bi, ti, lens: (bi, ti, 0)),
    )
    return pl.pallas_call(
        kernel,
        out_shape=jax.ShapeDtypeStruct((B, T, Cout), out_dtype),
        grid_spec=grid_spec,
        compiler_params=pltpu.CompilerParams(
            dimension_semantics=("parallel", "parallel"),
            vmem_limit_bytes=vmem_limit_bytes),
    )(lengths, xw, w, b)


# ---------------------------------------------------------------------------
# Kernel 2: the fused WN layer loop WITH the conditioning conv folded in.
#   grid = (B, T-tiles, L), L innermost & "arbitrary"; residual stream + skip
#   accumulate in f32 VMEM scratch; skip written (bf16) only on the last layer.
# ---------------------------------------------------------------------------
def wn_layers_fused(x0, c3, wpt, wps, wct, wcs, wqr, wqs, bias, lengths,
                    *, tile_t, vmem_limit_bytes):
    """x0: (B,T,H) bf16; c3: (B,T,3Cc) bf16 (K=3 im2col of masked c);
    wpt/wps/wqr/wqs: (L,H,H) bf16; wct/wcs: (L,3Cc,H) bf16;
    bias: (L,4,H) f32 = [b_tanh(pre+cond), b_sig(pre+cond), b_res, b_skip]."""
    B, T, H = x0.shape
    L = bias.shape[0]
    C3 = c3.shape[-1]
    assert T % tile_t == 0
    nT = T // tile_t

    # 2H-wide dots fill the 256-lane MXU (v6e/v7x); the slice at offset H is then
    # 128-aligned and free. Keep the split form otherwise (incl. v5e-friendly H=128).
    fuse = (H % 128 == 0)
    if fuse:
        w_stacks = [jnp.concatenate([wpt, wps], axis=-1),   # (L, H,   2H) [tanh|sig]
                    jnp.concatenate([wct, wcs], axis=-1),   # (L, 3Cc, 2H)
                    jnp.concatenate([wqr, wqs], axis=-1)]   # (L, H,   2H) [res|skip]
    else:
        w_stacks = [wpt, wps, wct, wcs, wqr, wqs]
    n_w = len(w_stacks)

    # VMEM-resident weight stacks (loaded once) when they fit; else streamed per layer.
    w_bytes = sum(int(w.size) * w.dtype.itemsize for w in w_stacks)
    resident = 2 * w_bytes <= vmem_limit_bytes // 2  # x2 headroom for buffering

    def w_spec(shape):
        _, d1, d2 = shape
        if resident:
            return pl.BlockSpec((L, d1, d2), lambda b, t, l, lens: (0, 0, 0))
        return pl.BlockSpec((1, d1, d2), lambda b, t, l, lens: (l, 0, 0))

    def kernel(lens_ref, x0_ref, c3_ref, *rest):
        w_refs = rest[:n_w]
        bias_ref = rest[n_w]
        skip_ref = rest[n_w + 1]
        x_acc = rest[n_w + 2]
        skip_acc = rest[n_w + 3]

        b = pl.program_id(0)
        ti = pl.program_id(1)
        l = pl.program_id(2)

        @pl.when(l == 0)
        def _():
            x_acc[...] = x0_ref[...].astype(jnp.float32)
            skip_acc[...] = jnp.zeros_like(skip_acc)

        n = lens_ref[b]
        t = jax.lax.broadcasted_iota(jnp.int32, (tile_t, 1), 0) + ti * tile_t
        keep = (t < n).astype(jnp.float32)

        wl = l if resident else 0
        bias_l = bias_ref[l]                      # (4, H), resident block
        x = x_acc[...]                            # residual stream (already masked)
        xb = x.astype(jnp.bfloat16)
        cb = c3_ref[...]                          # bf16; DMA'd once per (b, t) tile

        if fuse:
            w_pre, w_cond, w_post = (r[wl] for r in w_refs)
            pre = (jnp.dot(xb, w_pre, preferred_element_type=jnp.float32)
                   + jnp.dot(cb, w_cond, preferred_element_type=jnp.float32))
            in_t = pre[:, :H] + bias_l[0:1]
            in_s = pre[:, H:] + bias_l[1:2]
        else:
            wpt_l, wps_l, wct_l, wcs_l, wqr_l, wqs_l = (r[wl] for r in w_refs)
            in_t = (jnp.dot(xb, wpt_l, preferred_element_type=jnp.float32)
                    + jnp.dot(cb, wct_l, preferred_element_type=jnp.float32)
                    + bias_l[0:1])
            in_s = (jnp.dot(xb, wps_l, preferred_element_type=jnp.float32)
                    + jnp.dot(cb, wcs_l, preferred_element_type=jnp.float32)
                    + bias_l[1:2])

        # GTU; mask once after the gate — identical to masking preact/conact outputs
        # separately (tanh(b)*sigmoid(b) rows get zeroed here).
        acts = (jnp.tanh(in_t) * jax.nn.sigmoid(in_s)) * keep
        # TODO(synk): F.dropout omitted (eval-mode identity).
        actsb = acts.astype(jnp.bfloat16)

        if fuse:
            post = jnp.dot(actsb, w_post, preferred_element_type=jnp.float32)
            skip_acc[...] += (post[:, H:] + bias_l[3:4]) * keep

            @pl.when(l < L - 1)                    # no residual update on last layer
            def _():
                post_res = (post[:, :H] + bias_l[2:3]) * keep
                x_acc[...] = (x + post_res) * SQRT2
        else:
            skip_acc[...] += (jnp.dot(actsb, wqs_l, preferred_element_type=jnp.float32)
                              + bias_l[3:4]) * keep

            @pl.when(l < L - 1)
            def _():
                post_res = (jnp.dot(actsb, wqr_l, preferred_element_type=jnp.float32)
                            + bias_l[2:3]) * keep
                x_acc[...] = (x + post_res) * SQRT2

        @pl.when(l == L - 1)
        def _():
            skip_ref[...] = skip_acc[...].astype(skip_ref.dtype)

    grid_spec = pltpu.PrefetchScalarGridSpec(
        num_scalar_prefetch=1,
        grid=(B, nT, L),
        in_specs=[
            pl.BlockSpec((None, tile_t, H), lambda b, t, l, lens: (b, t, 0)),   # x0
            pl.BlockSpec((None, tile_t, C3), lambda b, t, l, lens: (b, t, 0)),  # c3
            *[w_spec(w.shape) for w in w_stacks],
            pl.BlockSpec((L, 4, H), lambda b, t, l, lens: (0, 0, 0)),           # biases
        ],
        out_specs=pl.BlockSpec((None, tile_t, H), lambda b, t, l, lens: (b, t, 0)),
        scratch_shapes=[pltpu.VMEM((tile_t, H), jnp.float32),   # residual stream
                        pltpu.VMEM((tile_t, H), jnp.float32)],  # skip accumulator
    )
    return pl.pallas_call(
        kernel,
        out_shape=jax.ShapeDtypeStruct((B, T, H), jnp.bfloat16),
        grid_spec=grid_spec,
        compiler_params=pltpu.CompilerParams(
            dimension_semantics=("parallel", "parallel", "arbitrary"),
            vmem_limit_bytes=vmem_limit_bytes),
    )(lengths, x0, c3, *w_stacks, bias)


# ---------------------------------------------------------------------------
# Parameter init (mirrors PyTorch Conv1d default uniform init) + packing to the
# kernel-friendly stacked / split bf16 layout.
# ---------------------------------------------------------------------------
def init_conv(key, k, cin, cout):
    kw, kb = jax.random.split(key)
    bound = 1.0 / math.sqrt(cin * k)
    w = jax.random.uniform(kw, (k, cin, cout), jnp.float32, -bound, bound)
    b = jax.random.uniform(kb, (cout,), jnp.float32, -bound, bound)
    return w, b


def init_params(key, in_ch, out_ch, hidden, cond_ch, n_blocks, n_layers):
    L = n_blocks * n_layers
    keys = jax.random.split(key, 3 + 3 * L)
    ki = iter(keys)
    params = {}
    params["pre"] = init_conv(next(ki), 3, in_ch, hidden)
    preacts, conacts, posacts = [], [], []
    for idx in range(L):
        is_last = idx == L - 1
        wp, bp = init_conv(next(ki), 1, hidden, 2 * hidden)   # 1x1 (dilation moot for k=1)
        preacts.append((wp[0], bp))
        conacts.append(init_conv(next(ki), 3, cond_ch, 2 * hidden))
        c_out = hidden if is_last else 2 * hidden
        wq, bq = init_conv(next(ki), 1, hidden, c_out)
        posacts.append((wq[0], bq))
    params["preacts"], params["conacts"], params["posacts"] = preacts, conacts, posacts
    w1, b1 = init_conv(next(ki), 3, hidden, hidden)
    params["post1"] = (w1 / math.sqrt(L), b1)                 # post1 weight /= sqrt(L)
    params["post2"] = init_conv(next(ki), 3, hidden, out_ch)
    return params


def pack_params(params, hidden, dtype=jnp.bfloat16):
    H = hidden
    L = len(params["preacts"])
    p = {}
    w, b = params["pre"];   p["w_pre"] = w.astype(dtype);   p["b_pre"] = b.reshape(1, -1)
    w, b = params["post1"]; p["w_post1"] = w.astype(dtype); p["b_post1"] = b.reshape(1, -1)
    w, b = params["post2"]; p["w_post2"] = w.astype(dtype); p["b_post2"] = b.reshape(1, -1)

    # preact 1x1 convs: tanh / sigmoid halves, stacked over layers
    p["wpt"] = jnp.stack([w[:, :H] for w, _ in params["preacts"]]).astype(dtype)
    p["wps"] = jnp.stack([w[:, H:] for w, _ in params["preacts"]]).astype(dtype)
    # conditioning K=3 convs, flattened to 1x1 over the im2col axis (3*Cc)
    p["wct"] = jnp.stack([w[:, :, :H].reshape(-1, H) for w, _ in params["conacts"]]).astype(dtype)
    p["wcs"] = jnp.stack([w[:, :, H:].reshape(-1, H) for w, _ in params["conacts"]]).astype(dtype)

    # posact 1x1 convs: residual / skip halves (last layer is skip-only)
    wqr, wqs, bqr, bqs = [], [], [], []
    for idx, (w, b) in enumerate(params["posacts"]):
        if idx == L - 1:
            wqr.append(jnp.zeros((H, H), jnp.float32)); bqr.append(jnp.zeros((H,), jnp.float32))
            wqs.append(w); bqs.append(b)
        else:
            wqr.append(w[:, :H]); bqr.append(b[:H])
            wqs.append(w[:, H:]); bqs.append(b[H:])
    p["wqr"] = jnp.stack(wqr).astype(dtype)
    p["wqs"] = jnp.stack(wqs).astype(dtype)

    # one resident bias block: [b_tanh(pre+cond), b_sig(pre+cond), b_res, b_skip]
    bias_t = jnp.stack([bp[:H] + bc[:H]
                        for (_, bp), (_, bc) in zip(params["preacts"], params["conacts"])])
    bias_s = jnp.stack([bp[H:] + bc[H:]
                        for (_, bp), (_, bc) in zip(params["preacts"], params["conacts"])])
    p["bias"] = jnp.stack([bias_t, bias_s, jnp.stack(bqr), jnp.stack(bqs)], axis=1)  # (L,4,H)
    return p


# ---------------------------------------------------------------------------
# Forward pass: 4 pallas_calls (pre, fused layer loop, post1, post2)
# ---------------------------------------------------------------------------
def dilated_wn_forward(packed, x, c, lengths):
    B, T, _ = x.shape
    lengths = lengths.astype(jnp.int32)

    tile_t, vmem_limit = _choose_tiling(T)
    T_pad = _round_up(T, tile_t)
    if T_pad != T:
        x = jnp.pad(x, ((0, 0), (0, T_pad - T), (0, 0)))
        c = jnp.pad(c, ((0, 0), (0, T_pad - T), (0, 0)))

    # masked conditioning + K=3 im2col -> cond conv becomes a per-layer 1x1 matmul
    tmask = (jnp.arange(T_pad)[None, :] < lengths[:, None]).astype(c.dtype)[..., None]
    cm = c * tmask                                            # c.masked_fill(mask, 0)
    c3 = jnp.concatenate([
        jnp.pad(cm, ((0, 0), (1, 0), (0, 0)))[:, :T_pad],     # c[t-1]
        cm,                                                   # c[t]
        jnp.pad(cm, ((0, 0), (0, 1), (0, 0)))[:, 1:],         # c[t+1]
    ], axis=-1).astype(jnp.bfloat16)

    x0 = conv1d_k3(x, packed["w_pre"], packed["b_pre"], lengths, tile_t,
                   vmem_limit_bytes=vmem_limit, out_dtype=jnp.bfloat16)
    skip = wn_layers_fused(x0, c3,
                           packed["wpt"], packed["wps"], packed["wct"], packed["wcs"],
                           packed["wqr"], packed["wqs"], packed["bias"], lengths,
                           tile_t=tile_t, vmem_limit_bytes=vmem_limit)
    h = conv1d_k3(skip, packed["w_post1"], packed["b_post1"], lengths, tile_t,
                  vmem_limit_bytes=vmem_limit, relu=True, out_dtype=jnp.bfloat16)
    out = conv1d_k3(h, packed["w_post2"], packed["b_post2"], lengths, tile_t,
                    vmem_limit_bytes=vmem_limit, out_dtype=jnp.float32)
    return out[:, :T] if T_pad != T else out


if __name__ == "__main__":
    B, T = 2, 16
    in_ch, out_ch, hidden, cond_ch = 4, 4, 32, 8
    n_blocks, n_layers = 2, 2

    key = jax.random.PRNGKey(0)
    k_params, k_x, k_c = jax.random.split(key, 3)
    params = init_params(k_params, in_ch, out_ch, hidden, cond_ch, n_blocks, n_layers)
    packed = pack_params(params, hidden)

    x = jax.random.normal(k_x, (B, T, in_ch), jnp.float32)
    c = jax.random.normal(k_c, (B, T, cond_ch), jnp.float32)
    lengths = jnp.array([16, 11], dtype=jnp.int32)

    fwd = jax.jit(dilated_wn_forward)
    y = fwd(packed, x, c, lengths)
    jax.block_until_ready(y)
    assert y.shape == (B, T, out_ch)
    print("KERNEL_OK")
</pallas_src>

<mosaic_0001>
module attributes {stable_mosaic.version = 11 : i64} {
  func.func @kernel(%arg0: i32, %arg1: i32, %arg2: memref<2xi32, #tpu.memory_space<smem>>, %arg3: memref<1x1x18x4xf32, #tpu.memory_space<vmem>>, %arg4: memref<3x4x32xbf16, #tpu.memory_space<vmem>>, %arg5: memref<1x32xf32, #tpu.memory_space<vmem>>, %arg6: memref<1x16x32xbf16, #tpu.memory_space<vmem>>) attributes {dimension_semantics = [#tpu.dimension_semantics<parallel>, #tpu.dimension_semantics<parallel>], iteration_bounds = array<i64: 2, 1>, scalar_prefetch = 1 : i64, scratch_operands = 0 : i64, tpu.core_type = #tpu.core_type<tc>, window_params = [{transform_indices = @transform_0, window_bounds = array<i64: 1, 1, 18, 4>}, {pipeline_mode = #tpu.pipeline_mode<synchronous>, transform_indices = @transform_1, window_bounds = array<i64: 3, 4, 32>}, {pipeline_mode = #tpu.pipeline_mode<synchronous>, transform_indices = @transform_2, window_bounds = array<i64: 1, 32>}, {transform_indices = @transform_3, window_bounds = array<i64: 1, 16, 32>}]} {
    %0 = arith.index_cast %arg0 : i32 to index
    %1 = memref.load %arg2[%0] : memref<2xi32, #tpu.memory_space<smem>>
    %c16_i32 = arith.constant 16 : i32
    %2 = arith.muli %arg1, %c16_i32 : i32
    %3 = tpu.iota {dimensions = array<i32: 0>} : vector<18x1xi32>
    %c1_i32 = arith.constant 1 : i32
    %4 = vector.broadcast %c1_i32 : i32 to vector<18x1xi32>
    %5 = arith.subi %3, %4 : vector<18x1xi32>
    %6 = vector.broadcast %2 : i32 to vector<18x1xi32>
    %7 = arith.addi %5, %6 : vector<18x1xi32>
    %c0 = arith.constant 0 : index
    %c0_0 = arith.constant 0 : index
    %c0_1 = arith.constant 0 : index
    %c0_2 = arith.constant 0 : index
    %8 = vector.load %arg3[%c0, %c0_0, %c0_1, %c0_2] : memref<1x1x18x4xf32, #tpu.memory_space<vmem>>, vector<1x1x18x4xf32>
    %9 = vector.shape_cast %8 : vector<1x1x18x4xf32> to vector<18x4xf32>
    %10 = vector.broadcast %1 : i32 to vector<18x1xi32>
    %11 = arith.cmpi slt, %7, %10 : vector<18x1xi32>
    %12 = arith.extui %11 : vector<18x1xi1> to vector<18x1xi32>
    %13 = arith.sitofp %12 : vector<18x1xi32> to vector<18x1xf32>
    %14 = vector.broadcast %13 : vector<18x1xf32> to vector<18x4xf32>
    %15 = arith.mulf %9, %14 : vector<18x4xf32>
    %16 = arith.truncf %15 : vector<18x4xf32> to vector<18x4xbf16>
    %c0_3 = arith.constant 0 : index
    %c0_4 = arith.constant 0 : index
    %c0_5 = arith.constant 0 : index
    %17 = vector.load %arg4[%c0_3, %c0_4, %c0_5] : memref<3x4x32xbf16, #tpu.memory_space<vmem>>, vector<3x4x32xbf16>
    %18 = vector.extract_strided_slice %16 {offsets = [0, 0], sizes = [16, 4], strides = [1, 1]} : vector<18x4xbf16> to vector<16x4xbf16>
    %19 = vector.extract_strided_slice %17 {offsets = [0, 0, 0], sizes = [1, 4, 32], strides = [1, 1, 1]} : vector<3x4x32xbf16> to vector<1x4x32xbf16>
    %20 = vector.shape_cast %19 : vector<1x4x32xbf16> to vector<4x32xbf16>
    %cst = arith.constant dense<0.000000e+00> : vector<16x32xf32>
    %21 = tpu.matmul %18, %20, %cst {dimension_numbers = #tpu.dot_dimension_numbers<[1], [0], [0], [1], [0, 0, 1, 1], [], []>} : vector<16x4xbf16>, vector<4x32xbf16>, vector<16x32xf32> -> vector<16x32xf32>
    %22 = vector.extract_strided_slice %16 {offsets = [1, 0], sizes = [16, 4], strides = [1, 1]} : vector<18x4xbf16> to vector<16x4xbf16>
    %23 = vector.extract_strided_slice %17 {offsets = [1, 0, 0], sizes = [1, 4, 32], strides = [1, 1, 1]} : vector<3x4x32xbf16> to vector<1x4x32xbf16>
    %24 = vector.shape_cast %23 : vector<1x4x32xbf16> to vector<4x32xbf16>
    %cst_6 = arith.constant dense<0.000000e+00> : vector<16x32xf32>
    %25 = tpu.matmul %22, %24, %cst_6 {dimension_numbers = #tpu.dot_dimension_numbers<[1], [0], [0], [1], [0, 0, 1, 1], [], []>} : vector<16x4xbf16>, vector<4x32xbf16>, vector<16x32xf32> -> vector<16x32xf32>
    %26 = arith.addf %21, %25 : vector<16x32xf32>
    %27 = vector.extract_strided_slice %16 {offsets = [2, 0], sizes = [16, 4], strides = [1, 1]} : vector<18x4xbf16> to vector<16x4xbf16>
    %28 = vector.extract_strided_slice %17 {offsets = [2, 0, 0], sizes = [1, 4, 32], strides = [1, 1, 1]} : vector<3x4x32xbf16> to vector<1x4x32xbf16>
    %29 = vector.shape_cast %28 : vector<1x4x32xbf16> to vector<4x32xbf16>
    %cst_7 = arith.constant dense<0.000000e+00> : vector<16x32xf32>
    %30 = tpu.matmul %27, %29, %cst_7 {dimension_numbers = #tpu.dot_dimension_numbers<[1], [0], [0], [1], [0, 0, 1, 1], [], []>} : vector<16x4xbf16>, vector<4x32xbf16>, vector<16x32xf32> -> vector<16x32xf32>
    %31 = arith.addf %26, %30 : vector<16x32xf32>
    %c0_8 = arith.constant 0 : index
    %c0_9 = arith.constant 0 : index
    %32 = vector.load %arg5[%c0_8, %c0_9] : memref<1x32xf32, #tpu.memory_space<vmem>>, vector<1x32xf32>
    %33 = vector.broadcast %32 : vector<1x32xf32> to vector<16x32xf32>
    %34 = arith.addf %31, %33 : vector<16x32xf32>
    %35 = tpu.iota {dimensions = array<i32: 0>} : vector<16x1xi32>
    %36 = vector.broadcast %2 : i32 to vector<16x1xi32>
    %37 = arith.addi %35, %36 : vector<16x1xi32>
    %38 = vector.broadcast %1 : i32 to vector<16x1xi32>
    %39 = arith.cmpi slt, %37, %38 : vector<16x1xi32>
    %40 = arith.extui %39 : vector<16x1xi1> to vector<16x1xi32>
    %41 = arith.sitofp %40 : vector<16x1xi32> to vector<16x1xf32>
    %42 = vector.broadcast %41 : vector<16x1xf32> to vector<16x32xf32>
    %43 = arith.mulf %34, %42 : vector<16x32xf32>
    %44 = arith.truncf %43 : vector<16x32xf32> to vector<16x32xbf16>
    %c0_10 = arith.constant 0 : index
    %c0_11 = arith.constant 0 : index
    %c0_12 = arith.constant 0 : index
    %45 = vector.load %arg6[%c0_10, %c0_11, %c0_12] : memref<1x16x32xbf16, #tpu.memory_space<vmem>>, vector<1x16x32xbf16>
    %46 = vector.shape_cast %45 : vector<1x16x32xbf16> to vector<16x32xbf16>
    %47 = vector.shape_cast %44 : vector<16x32xbf16> to vector<1x16x32xbf16>
    tpu.vector_store %arg6[%c0_10, %c0_11, %c0_12], %47 {strides = array<i32>} : memref<1x16x32xbf16, #tpu.memory_space<vmem>>, vector<1x16x32xbf16>,
    return
  }
  func.func @transform_0(%arg0: i32, %arg1: i32, %arg2: memref<2xi32, #tpu.memory_space<smem>>) -> (i32, i32, i32, i32) {
    %c0_i32 = arith.constant 0 : i32
    %c0_i32_0 = arith.constant 0 : i32
    %c0_i32_1 = arith.constant 0 : i32
    return %arg0, %arg1, %c0_i32, %c0_i32_0 : i32, i32, i32, i32
  }
  func.func @transform_1(%arg0: i32, %arg1: i32, %arg2: memref<2xi32, #tpu.memory_space<smem>>) -> (i32, i32, i32) {
    %c0_i32 = arith.constant 0 : i32
    %c0_i32_0 = arith.constant 0 : i32
    %c0_i32_1 = arith.constant 0 : i32
    %c0_i32_2 = arith.constant 0 : i32
    return %c0_i32, %c0_i32_0, %c0_i32_1 : i32, i32, i32
  }
  func.func @transform_2(%arg0: i32, %arg1: i32, %arg2: memref<2xi32, #tpu.memory_space<smem>>) -> (i32, i32) {
    %c0_i32 = arith.constant 0 : i32
    %c0_i32_0 = arith.constant 0 : i32
    %c0_i32_1 = arith.constant 0 : i32
    return %c0_i32, %c0_i32_0 : i32, i32
  }
  func.func @transform_3(%arg0: i32, %arg1: i32, %arg2: memref<2xi32, #tpu.memory_space<smem>>) -> (i32, i32, i32) {
    %c0_i32 = arith.constant 0 : i32
    %c0_i32_0 = arith.constant 0 : i32
    return %arg0, %arg1, %c0_i32 : i32, i32, i32
  }
}

module attributes {stable_mosaic.version = 11 : i64} {
  func.func @kernel(%arg0: i32, %arg1: i32, %arg2: i32, %arg3: memref<2xi32, #tpu.memory_space<smem>>, %arg4: memref<1x16x32xbf16, #tpu.memory_space<vmem>>, %arg5: memref<1x16x24xbf16, #tpu.memory_space<vmem>>, %arg6: memref<4x32x32xbf16, #tpu.memory_space<vmem>>, %arg7: memref<4x32x32xbf16, #tpu.memory_space<vmem>>, %arg8: memref<4x24x32xbf16, #tpu.memory_space<vmem>>, %arg9: memref<4x24x32xbf16, #tpu.memory_space<vmem>>, %arg10: memref<4x32x32xbf16, #tpu.memory_space<vmem>>, %arg11: memref<4x32x32xbf16, #tpu.memory_space<vmem>>, %arg12: memref<4x4x32xf32, #tpu.memory_space<vmem>>, %arg13: memref<1x16x32xbf16, #tpu.memory_space<vmem>>, %arg14: memref<16x32xf32, #tpu.memory_space<vmem>>, %arg15: memref<16x32xf32, #tpu.memory_space<vmem>>) attributes {dimension_semantics = [#tpu.dimension_semantics<parallel>, #tpu.dimension_semantics<parallel>, #tpu.dimension_semantics<arbitrary>], iteration_bounds = array<i64: 2, 1, 4>, scalar_prefetch = 1 : i64, scratch_operands = 2 : i64, tpu.core_type = #tpu.core_type<tc>, window_params = [{transform_indices = @transform_0, window_bounds = array<i64: 1, 16, 32>}, {transform_indices = @transform_1, window_bounds = array<i64: 1, 16, 24>}, {pipeline_mode = #tpu.pipeline_mode<synchronous>, transform_indices = @transform_2, window_bounds = array<i64: 4, 32, 32>}, {pipeline_mode = #tpu.pipeline_mode<synchronous>, transform_indices = @transform_3, window_bounds = array<i64: 4, 32, 32>}, {pipeline_mode = #tpu.pipeline_mode<synchronous>, transform_indices = @transform_4, window_bounds = array<i64: 4, 24, 32>}, {pipeline_mode = #tpu.pipeline_mode<synchronous>, transform_indices = @transform_5, window_bounds = array<i64: 4, 24, 32>}, {pipeline_mode = #tpu.pipeline_mode<synchronous>, transform_indices = @transform_6, window_bounds = array<i64: 4, 32, 32>}, {pipeline_mode = #tpu.pipeline_mode<synchronous>, transform_indices = @transform_7, window_bounds = array<i64: 4, 32, 32>}, {pipeline_mode = #tpu.pipeline_mode<synchronous>, transform_indices = @transform_8, window_bounds = array<i64: 4, 4, 32>}, {transform_indices = @transform_9, window_bounds = array<i64: 1, 16, 32>}]} {
    %c0_i32 = arith.constant 0 : i32
    %0 = arith.cmpi eq, %arg2, %c0_i32 : i32
    %1 = arith.extui %0 : i1 to i32
    %c0_i32_0 = arith.constant 0 : i32
    %2 = arith.cmpi ne, %1, %c0_i32_0 : i32
    scf.if %2 {
      %c0_31 = arith.constant 0 : index
      %c0_32 = arith.constant 0 : index
      %c0_33 = arith.constant 0 : index
      %75 = vector.load %arg4[%c0_31, %c0_32, %c0_33] : memref<1x16x32xbf16, #tpu.memory_space<vmem>>, vector<1x16x32xbf16>
      %76 = vector.shape_cast %75 : vector<1x16x32xbf16> to vector<16x32xbf16>
      %77 = arith.extf %76 : vector<16x32xbf16> to vector<16x32xf32>
      %c0_34 = arith.constant 0 : index
      %c0_35 = arith.constant 0 : index
      %78 = vector.load %arg14[%c0_34, %c0_35] : memref<16x32xf32, #tpu.memory_space<vmem>>, vector<16x32xf32>
      tpu.vector_store %arg14[%c0_34, %c0_35], %77 {strides = array<i32>} : memref<16x32xf32, #tpu.memory_space<vmem>>, vector<16x32xf32>,
      %cst_36 = arith.constant 0.000000e+00 : f32
      %79 = vector.broadcast %cst_36 : f32 to vector<16x32xf32>
      %c0_37 = arith.constant 0 : index
      %c0_38 = arith.constant 0 : index
      %80 = vector.load %arg15[%c0_37, %c0_38] : memref<16x32xf32, #tpu.memory_space<vmem>>, vector<16x32xf32>
      tpu.vector_store %arg15[%c0_37, %c0_38], %79 {strides = array<i32>} : memref<16x32xf32, #tpu.memory_space<vmem>>, vector<16x32xf32>,
    } else {
    }
    %3 = arith.index_cast %arg0 : i32 to index
    %4 = memref.load %arg3[%3] : memref<2xi32, #tpu.memory_space<smem>>
    %5 = tpu.iota {dimensions = array<i32: 0>} : vector<16x1xi32>
    %c16_i32 = arith.constant 16 : i32
    %6 = arith.muli %arg1, %c16_i32 : i32
    %7 = vector.broadcast %6 : i32 to vector<16x1xi32>
    %8 = arith.addi %5, %7 : vector<16x1xi32>
    %9 = vector.broadcast %4 : i32 to vector<16x1xi32>
    %10 = arith.cmpi slt, %8, %9 : vector<16x1xi32>
    %11 = arith.extui %10 : vector<16x1xi1> to vector<16x1xi32>
    %12 = arith.sitofp %11 : vector<16x1xi32> to vector<16x1xf32>
    %13 = arith.index_cast %arg2 : i32 to index
    %c0 = arith.constant 0 : index
    %c0_1 = arith.constant 0 : index
    %14 = vector.load %arg12[%13, %c0, %c0_1] : memref<4x4x32xf32, #tpu.memory_space<vmem>>, vector<1x4x32xf32>
    %15 = vector.shape_cast %14 : vector<1x4x32xf32> to vector<4x32xf32>
    %c0_2 = arith.constant 0 : index
    %c0_3 = arith.constant 0 : index
    %16 = vector.load %arg14[%c0_2, %c0_3] : memref<16x32xf32, #tpu.memory_space<vmem>>, vector<16x32xf32>
    %17 = arith.truncf %16 : vector<16x32xf32> to vector<16x32xbf16>
    %c0_4 = arith.constant 0 : index
    %c0_5 = arith.constant 0 : index
    %c0_6 = arith.constant 0 : index
    %18 = vector.load %arg5[%c0_4, %c0_5, %c0_6] : memref<1x16x24xbf16, #tpu.memory_space<vmem>>, vector<1x16x24xbf16>
    %19 = vector.shape_cast %18 : vector<1x16x24xbf16> to vector<16x24xbf16>
    %20 = arith.index_cast %arg2 : i32 to index
    %c0_7 = arith.constant 0 : index
    %c0_8 = arith.constant 0 : index
    %21 = vector.load %arg6[%20, %c0_7, %c0_8] : memref<4x32x32xbf16, #tpu.memory_space<vmem>>, vector<1x32x32xbf16>
    %22 = vector.shape_cast %21 : vector<1x32x32xbf16> to vector<32x32xbf16>
    %23 = arith.index_cast %arg2 : i32 to index
    %c0_9 = arith.constant 0 : index
    %c0_10 = arith.constant 0 : index
    %24 = vector.load %arg7[%23, %c0_9, %c0_10] : memref<4x32x32xbf16, #tpu.memory_space<vmem>>, vector<1x32x32xbf16>
    %25 = vector.shape_cast %24 : vector<1x32x32xbf16> to vector<32x32xbf16>
    %26 = arith.index_cast %arg2 : i32 to index
    %c0_11 = arith.constant 0 : index
    %c0_12 = arith.constant 0 : index
    %27 = vector.load %arg8[%26, %c0_11, %c0_12] : memref<4x24x32xbf16, #tpu.memory_space<vmem>>, vector<1x24x32xbf16>
    %28 = vector.shape_cast %27 : vector<1x24x32xbf16> to vector<24x32xbf16>
    %29 = arith.index_cast %arg2 : i32 to index
    %c0_13 = arith.constant 0 : index
    %c0_14 = arith.constant 0 : index
    %30 = vector.load %arg9[%29, %c0_13, %c0_14] : memref<4x24x32xbf16, #tpu.memory_space<vmem>>, vector<1x24x32xbf16>
    %31 = vector.shape_cast %30 : vector<1x24x32xbf16> to vector<24x32xbf16>
    %32 = arith.index_cast %arg2 : i32 to index
    %c0_15 = arith.constant 0 : index
    %c0_16 = arith.constant 0 : index
    %33 = vector.load %arg10[%32, %c0_15, %c0_16] : memref<4x32x32xbf16, #tpu.memory_space<vmem>>, vector<1x32x32xbf16>
    %34 = vector.shape_cast %33 : vector<1x32x32xbf16> to vector<32x32xbf16>
    %35 = arith.index_cast %arg2 : i32 to index
    %c0_17 = arith.constant 0 : index
    %c0_18 = arith.constant 0 : index
    %36 = vector.load %arg11[%35, %c0_17, %c0_18] : memref<4x32x32xbf16, #tpu.memory_space<vmem>>, vector<1x32x32xbf16>
    %37 = vector.shape_cast %36 : vector<1x32x32xbf16> to vector<32x32xbf16>
    %cst = arith.constant dense<0.000000e+00> : vector<16x32xf32>
    %38 = tpu.matmul %17, %22, %cst {dimension_numbers = #tpu.dot_dimension_numbers<[1], [0], [0], [1], [0, 0, 1, 1], [], []>} : vector<16x32xbf16>, vector<32x32xbf16>, vector<16x32xf32> -> vector<16x32xf32>
    %cst_19 = arith.constant dense<0.000000e+00> : vector<16x32xf32>
    %39 = tpu.matmul %19, %28, %cst_19 {dimension_numbers = #tpu.dot_dimension_numbers<[1], [0], [0], [1], [0, 0, 1, 1], [], []>} : vector<16x24xbf16>, vector<24x32xbf16>, vector<16x32xf32> -> vector<16x32xf32>
    %40 = arith.addf %38, %39 : vector<16x32xf32>
    %41 = vector.extract_strided_slice %15 {offsets = [0, 0], sizes = [1, 32], strides = [1, 1]} : vector<4x32xf32> to vector<1x32xf32>
    %42 = vector.broadcast %41 : vector<1x32xf32> to vector<16x32xf32>
    %43 = arith.addf %40, %42 : vector<16x32xf32>
    %cst_20 = arith.constant dense<0.000000e+00> : vector<16x32xf32>
    %44 = tpu.matmul %17, %25, %cst_20 {dimension_numbers = #tpu.dot_dimension_numbers<[1], [0], [0], [1], [0, 0, 1, 1], [], []>} : vector<16x32xbf16>, vector<32x32xbf16>, vector<16x32xf32> -> vector<16x32xf32>
    %cst_21 = arith.constant dense<0.000000e+00> : vector<16x32xf32>
    %45 = tpu.matmul %19, %31, %cst_21 {dimension_numbers = #tpu.dot_dimension_numbers<[1], [0], [0], [1], [0, 0, 1, 1], [], []>} : vector<16x24xbf16>, vector<24x32xbf16>, vector<16x32xf32> -> vector<16x32xf32>
    %46 = arith.addf %44, %45 : vector<16x32xf32>
    %47 = vector.extract_strided_slice %15 {offsets = [1, 0], sizes = [1, 32], strides = [1, 1]} : vector<4x32xf32> to vector<1x32xf32>
    %48 = vector.broadcast %47 : vector<1x32xf32> to vector<16x32xf32>
    %49 = arith.addf %46, %48 : vector<16x32xf32>
    %50 = math.tanh %43 : vector<16x32xf32>
    %51 = arith.negf %49 : vector<16x32xf32>
    %52 = math.exp %51 : vector<16x32xf32>
    %cst_22 = arith.constant 1.000000e+00 : f32
    %53 = vector.broadcast %cst_22 : f32 to vector<16x32xf32>
    %54 = arith.addf %53, %52 : vector<16x32xf32>
    %55 = arith.divf %53, %54 : vector<16x32xf32>
    %56 = arith.mulf %50, %55 : vector<16x32xf32>
    %57 = vector.broadcast %12 : vector<16x1xf32> to vector<16x32xf32>
    %58 = arith.mulf %56, %57 : vector<16x32xf32>
    %59 = arith.truncf %58 : vector<16x32xf32> to vector<16x32xbf16>
    %c0_23 = arith.constant 0 : index
    %c0_24 = arith.constant 0 : index
    %60 = vector.load %arg15[%c0_23, %c0_24] : memref<16x32xf32, #tpu.memory_space<vmem>>, vector<16x32xf32>
    %cst_25 = arith.constant dense<0.000000e+00> : vector<16x32xf32>
    %61 = tpu.matmul %59, %37, %cst_25 {dimension_numbers = #tpu.dot_dimension_numbers<[1], [0], [0], [1], [0, 0, 1, 1], [], []>} : vector<16x32xbf16>, vector<32x32xbf16>, vector<16x32xf32> -> vector<16x32xf32>
    %62 = vector.extract_strided_slice %15 {offsets = [3, 0], sizes = [1, 32], strides = [1, 1]} : vector<4x32xf32> to vector<1x32xf32>
    %63 = vector.broadcast %62 : vector<1x32xf32> to vector<16x32xf32>
    %64 = arith.addf %61, %63 : vector<16x32xf32>
    %65 = vector.broadcast %12 : vector<16x1xf32> to vector<16x32xf32>
    %66 = arith.mulf %64, %65 : vector<16x32xf32>
    %67 = arith.addf %60, %66 : vector<16x32xf32>
    %c0_26 = arith.constant 0 : index
    %c0_27 = arith.constant 0 : index
    %68 = vector.load %arg15[%c0_26, %c0_27] : memref<16x32xf32, #tpu.memory_space<vmem>>, vector<16x32xf32>
    tpu.vector_store %arg15[%c0_26, %c0_27], %67 {strides = array<i32>} : memref<16x32xf32, #tpu.memory_space<vmem>>, vector<16x32xf32>,
    %c3_i32 = arith.constant 3 : i32
    %69 = arith.cmpi slt, %arg2, %c3_i32 : i32
    %70 = arith.extui %69 : i1 to i32
    %c0_i32_28 = arith.constant 0 : i32
    %71 = arith.cmpi ne, %70, %c0_i32_28 : i32
    scf.if %71 {
      %cst_31 = arith.constant dense<0.000000e+00> : vector<16x32xf32>
      %75 = tpu.matmul %59, %34, %cst_31 {dimension_numbers = #tpu.dot_dimension_numbers<[1], [0], [0], [1], [0, 0, 1, 1], [], []>} : vector<16x32xbf16>, vector<32x32xbf16>, vector<16x32xf32> -> vector<16x32xf32>
      %76 = vector.extract_strided_slice %15 {offsets = [2, 0], sizes = [1, 32], strides = [1, 1]} : vector<4x32xf32> to vector<1x32xf32>
      %77 = vector.broadcast %76 : vector<1x32xf32> to vector<16x32xf32>
      %78 = arith.addf %75, %77 : vector<16x32xf32>
      %79 = vector.broadcast %12 : vector<16x1xf32> to vector<16x32xf32>
      %80 = arith.mulf %78, %79 : vector<16x32xf32>
      %81 = arith.addf %16, %80 : vector<16x32xf32>
      %cst_32 = arith.constant 1.41421354 : f32
      %82 = vector.broadcast %cst_32 : f32 to vector<16x32xf32>
      %83 = arith.mulf %81, %82 : vector<16x32xf32>
      %c0_33 = arith.constant 0 : index
      %c0_34 = arith.constant 0 : index
      %84 = vector.load %arg14[%c0_33, %c0_34] : memref<16x32xf32, #tpu.memory_space<vmem>>, vector<16x32xf32>
      tpu.vector_store %arg14[%c0_33, %c0_34], %83 {strides = array<i32>} : memref<16x32xf32, #tpu.memory_space<vmem>>, vector<16x32xf32>,
    } else {
    }
    %c3_i32_29 = arith.constant 3 : i32
    %72 = arith.cmpi eq, %arg2, %c3_i32_29 : i32
    %73 = arith.extui %72 : i1 to i32
    %c0_i32_30 = arith.constant 0 : i32
    %74 = arith.cmpi ne, %73, %c0_i32_30 : i32
    scf.if %74 {
      %c0_31 = arith.constant 0 : index
      %c0_32 = arith.constant 0 : index
      %75 = vector.load %arg15[%c0_31, %c0_32] : memref<16x32xf32, #tpu.memory_space<vmem>>, vector<16x32xf32>
      %76 = arith.truncf %75 : vector<16x32xf32> to vector<16x32xbf16>
      %c0_33 = arith.constant 0 : index
      %c0_34 = arith.constant 0 : index
      %c0_35 = arith.constant 0 : index
      %77 = vector.load %arg13[%c0_33, %c0_34, %c0_35] : memref<1x16x32xbf16, #tpu.memory_space<vmem>>, vector<1x16x32xbf16>
      %78 = vector.shape_cast %77 : vector<1x16x32xbf16> to vector<16x32xbf16>
      %79 = vector.shape_cast %76 : vector<16x32xbf16> to vector<1x16x32xbf16>
      tpu.vector_store %arg13[%c0_33, %c0_34, %c0_35], %79 {strides = array<i32>} : memref<1x16x32xbf16, #tpu.memory_space<vmem>>, vector<1x16x32xbf16>,
    } else {
    }
    return
  }
  func.func @transform_0(%arg0: i32, %arg1: i32, %arg2: i32, %arg3: memref<2xi32, #tpu.memory_space<smem>>) -> (i32, i32, i32) {
    %c0_i32 = arith.constant 0 : i32
    %c0_i32_0 = arith.constant 0 : i32
    return %arg0, %arg1, %c0_i32 : i32, i32, i32
  }
  func.func @transform_1(%arg0: i32, %arg1: i32, %arg2: i32, %arg3: memref<2xi32, #tpu.memory_space<smem>>) -> (i32, i32, i32) {
    %c0_i32 = arith.constant 0 : i32
    %c0_i32_0 = arith.constant 0 : i32
    return %arg0, %arg1, %c0_i32 : i32, i32, i32
  }
  func.func @transform_2(%arg0: i32, %arg1: i32, %arg2: i32, %arg3: memref<2xi32, #tpu.memory_space<smem>>) -> (i32, i32, i32) {
    %c0_i32 = arith.constant 0 : i32
    %c0_i32_0 = arith.constant 0 : i32
    %c0_i32_1 = arith.constant 0 : i32
    %c0_i32_2 = arith.constant 0 : i32
    return %c0_i32, %c0_i32_0, %c0_i32_1 : i32, i32, i32
  }
  func.func @transform_3(%arg0: i32, %arg1: i32, %arg2: i32, %arg3: memref<2xi32, #tpu.memory_space<smem>>) -> (i32, i32, i32) {
    %c0_i32 = arith.constant 0 : i32
    %c0_i32_0 = arith.constant 0 : i32
    %c0_i32_1 = arith.constant 0 : i32
    %c0_i32_2 = arith.constant 0 : i32
    return %c0_i32, %c0_i32_0, %c0_i32_1 : i32, i32, i32
  }
  func.func @transform_4(%arg0: i32, %arg1: i32, %arg2: i32, %arg3: memref<2xi32, #tpu.memory_space<smem>>) -> (i32, i32, i32) {
    %c0_i32 = arith.constant 0 : i32
    %c0_i32_0 = arith.constant 0 : i32
    %c0_i32_1 = arith.constant 0 : i32
    %c0_i32_2 = arith.constant 0 : i32
    return %c0_i32, %c0_i32_0, %c0_i32_1 : i32, i32, i32
  }
  func.func @transform_5(%arg0: i32, %arg1: i32, %arg2: i32, %arg3: memref<2xi32, #tpu.memory_space<smem>>) -> (i32, i32, i32) {
    %c0_i32 = arith.constant 0 : i32
    %c0_i32_0 = arith.constant 0 : i32
    %c0_i32_1 = arith.constant 0 : i32
    %c0_i32_2 = arith.constant 0 : i32
    return %c0_i32, %c0_i32_0, %c0_i32_1 : i32, i32, i32
  }
  func.func @transform_6(%arg0: i32, %arg1: i32, %arg2: i32, %arg3: memref<2xi32, #tpu.memory_space<smem>>) -> (i32, i32, i32) {
    %c0_i32 = arith.constant 0 : i32
    %c0_i32_0 = arith.constant 0 : i32
    %c0_i32_1 = arith.constant 0 : i32
    %c0_i32_2 = arith.constant 0 : i32
    return %c0_i32, %c0_i32_0, %c0_i32_1 : i32, i32, i32
  }
  func.func @transform_7(%arg0: i32, %arg1: i32, %arg2: i32, %arg3: memref<2xi32, #tpu.memory_space<smem>>) -> (i32, i32, i32) {
    %c0_i32 = arith.constant 0 : i32
    %c0_i32_0 = arith.constant 0 : i32
    %c0_i32_1 = arith.constant 0 : i32
    %c0_i32_2 = arith.constant 0 : i32
    return %c0_i32, %c0_i32_0, %c0_i32_1 : i32, i32, i32
  }
  func.func @transform_8(%arg0: i32, %arg1: i32, %arg2: i32, %arg3: memref<2xi32, #tpu.memory_space<smem>>) -> (i32, i32, i32) {
    %c0_i32 = arith.constant 0 : i32
    %c0_i32_0 = arith.constant 0 : i32
    %c0_i32_1 = arith.constant 0 : i32
    %c0_i32_2 = arith.constant 0 : i32
    return %c0_i32, %c0_i32_0, %c0_i32_1 : i32, i32, i32
  }
  func.func @transform_9(%arg0: i32, %arg1: i32, %arg2: i32, %arg3: memref<2xi32, #tpu.memory_space<smem>>) -> (i32, i32, i32) {
    %c0_i32 = arith.constant 0 : i32
    %c0_i32_0 = arith.constant 0 : i32
    return %arg0, %arg1, %c0_i32 : i32, i32, i32
  }
}

module attributes {stable_mosaic.version = 11 : i64} {
  func.func @kernel(%arg0: i32, %arg1: i32, %arg2: memref<2xi32, #tpu.memory_space<smem>>, %arg3: memref<1x1x18x32xbf16, #tpu.memory_space<vmem>>, %arg4: memref<3x32x32xbf16, #tpu.memory_space<vmem>>, %arg5: memref<1x32xf32, #tpu.memory_space<vmem>>, %arg6: memref<1x16x32xbf16, #tpu.memory_space<vmem>>) attributes {dimension_semantics = [#tpu.dimension_semantics<parallel>, #tpu.dimension_semantics<parallel>], iteration_bounds = array<i64: 2, 1>, scalar_prefetch = 1 : i64, scratch_operands = 0 : i64, tpu.core_type = #tpu.core_type<tc>, window_params = [{transform_indices = @transform_0, window_bounds = array<i64: 1, 1, 18, 32>}, {pipeline_mode = #tpu.pipeline_mode<synchronous>, transform_indices = @transform_1, window_bounds = array<i64: 3, 32, 32>}, {pipeline_mode = #tpu.pipeline_mode<synchronous>, transform_indices = @transform_2, window_bounds = array<i64: 1, 32>}, {transform_indices = @transform_3, window_bounds = array<i64: 1, 16, 32>}]} {
    %0 = arith.index_cast %arg0 : i32 to index
    %1 = memref.load %arg2[%0] : memref<2xi32, #tpu.memory_space<smem>>
    %c16_i32 = arith.constant 16 : i32
    %2 = arith.muli %arg1, %c16_i32 : i32
    %3 = tpu.iota {dimensions = array<i32: 0>} : vector<18x1xi32>
    %c1_i32 = arith.constant 1 : i32
    %4 = vector.broadcast %c1_i32 : i32 to vector<18x1xi32>
    %5 = arith.subi %3, %4 : vector<18x1xi32>
    %6 = vector.broadcast %2 : i32 to vector<18x1xi32>
    %7 = arith.addi %5, %6 : vector<18x1xi32>
    %c0 = arith.constant 0 : index
    %c0_0 = arith.constant 0 : index
    %c0_1 = arith.constant 0 : index
    %c0_2 = arith.constant 0 : index
    %8 = vector.load %arg3[%c0, %c0_0, %c0_1, %c0_2] : memref<1x1x18x32xbf16, #tpu.memory_space<vmem>>, vector<1x1x18x32xbf16>
    %9 = vector.shape_cast %8 : vector<1x1x18x32xbf16> to vector<18x32xbf16>
    %10 = vector.broadcast %1 : i32 to vector<18x1xi32>
    %11 = arith.cmpi slt, %7, %10 : vector<18x1xi32>
    %12 = arith.extui %11 : vector<18x1xi1> to vector<18x1xi32>
    %13 = arith.sitofp %12 : vector<18x1xi32> to vector<18x1xf32>
    %14 = arith.truncf %13 : vector<18x1xf32> to vector<18x1xbf16>
    %15 = vector.broadcast %14 : vector<18x1xbf16> to vector<18x32xbf16>
    %16 = arith.mulf %9, %15 : vector<18x32xbf16>
    %c0_3 = arith.constant 0 : index
    %c0_4 = arith.constant 0 : index
    %c0_5 = arith.constant 0 : index
    %17 = vector.load %arg4[%c0_3, %c0_4, %c0_5] : memref<3x32x32xbf16, #tpu.memory_space<vmem>>, vector<3x32x32xbf16>
    %18 = vector.extract_strided_slice %16 {offsets = [0, 0], sizes = [16, 32], strides = [1, 1]} : vector<18x32xbf16> to vector<16x32xbf16>
    %19 = vector.extract_strided_slice %17 {offsets = [0, 0, 0], sizes = [1, 32, 32], strides = [1, 1, 1]} : vector<3x32x32xbf16> to vector<1x32x32xbf16>
    %20 = vector.shape_cast %19 : vector<1x32x32xbf16> to vector<32x32xbf16>
    %cst = arith.constant dense<0.000000e+00> : vector<16x32xf32>
    %21 = tpu.matmul %18, %20, %cst {dimension_numbers = #tpu.dot_dimension_numbers<[1], [0], [0], [1], [0, 0, 1, 1], [], []>} : vector<16x32xbf16>, vector<32x32xbf16>, vector<16x32xf32> -> vector<16x32xf32>
    %22 = vector.extract_strided_slice %16 {offsets = [1, 0], sizes = [16, 32], strides = [1, 1]} : vector<18x32xbf16> to vector<16x32xbf16>
    %23 = vector.extract_strided_slice %17 {offsets = [1, 0, 0], sizes = [1, 32, 32], strides = [1, 1, 1]} : vector<3x32x32xbf16> to vector<1x32x32xbf16>
    %24 = vector.shape_cast %23 : vector<1x32x32xbf16> to vector<32x32xbf16>
    %cst_6 = arith.constant dense<0.000000e+00> : vector<16x32xf32>
    %25 = tpu.matmul %22, %24, %cst_6 {dimension_numbers = #tpu.dot_dimension_numbers<[1], [0], [0], [1], [0, 0, 1, 1], [], []>} : vector<16x32xbf16>, vector<32x32xbf16>, vector<16x32xf32> -> vector<16x32xf32>
    %26 = arith.addf %21, %25 : vector<16x32xf32>
    %27 = vector.extract_strided_slice %16 {offsets = [2, 0], sizes = [16, 32], strides = [1, 1]} : vector<18x32xbf16> to vector<16x32xbf16>
    %28 = vector.extract_strided_slice %17 {offsets = [2, 0, 0], sizes = [1, 32, 32], strides = [1, 1, 1]} : vector<3x32x32xbf16> to vector<1x32x32xbf16>
    %29 = vector.shape_cast %28 : vector<1x32x32xbf16> to vector<32x32xbf16>
    %cst_7 = arith.constant dense<0.000000e+00> : vector<16x32xf32>
    %30 = tpu.matmul %27, %29, %cst_7 {dimension_numbers = #tpu.dot_dimension_numbers<[1], [0], [0], [1], [0, 0, 1, 1], [], []>} : vector<16x32xbf16>, vector<32x32xbf16>, vector<16x32xf32> -> vector<16x32xf32>
    %31 = arith.addf %26, %30 : vector<16x32xf32>
    %c0_8 = arith.constant 0 : index
    %c0_9 = arith.constant 0 : index
    %32 = vector.load %arg5[%c0_8, %c0_9] : memref<1x32xf32, #tpu.memory_space<vmem>>, vector<1x32xf32>
    %33 = vector.broadcast %32 : vector<1x32xf32> to vector<16x32xf32>
    %34 = arith.addf %31, %33 : vector<16x32xf32>
    %cst_10 = arith.constant 0.000000e+00 : f32
    %35 = vector.broadcast %cst_10 : f32 to vector<16x32xf32>
    %36 = arith.maximumf %34, %35 : vector<16x32xf32>
    %37 = tpu.iota {dimensions = array<i32: 0>} : vector<16x1xi32>
    %38 = vector.broadcast %2 : i32 to vector<16x1xi32>
    %39 = arith.addi %37, %38 : vector<16x1xi32>
    %40 = vector.broadcast %1 : i32 to vector<16x1xi32>
    %41 = arith.cmpi slt, %39, %40 : vector<16x1xi32>
    %42 = arith.extui %41 : vector<16x1xi1> to vector<16x1xi32>
    %43 = arith.sitofp %42 : vector<16x1xi32> to vector<16x1xf32>
    %44 = vector.broadcast %43 : vector<16x1xf32> to vector<16x32xf32>
    %45 = arith.mulf %36, %44 : vector<16x32xf32>
    %46 = arith.truncf %45 : vector<16x32xf32> to vector<16x32xbf16>
    %c0_11 = arith.constant 0 : index
    %c0_12 = arith.constant 0 : index
    %c0_13 = arith.constant 0 : index
    %47 = vector.load %arg6[%c0_11, %c0_12, %c0_13] : memref<1x16x32xbf16, #tpu.memory_space<vmem>>, vector<1x16x32xbf16>
    %48 = vector.shape_cast %47 : vector<1x16x32xbf16> to vector<16x32xbf16>
    %49 = vector.shape_cast %46 : vector<16x32xbf16> to vector<1x16x32xbf16>
    tpu.vector_store %arg6[%c0_11, %c0_12, %c0_13], %49 {strides = array<i32>} : memref<1x16x32xbf16, #tpu.memory_space<vmem>>, vector<1x16x32xbf16>,
    return
  }
  func.func @transform_0(%arg0: i32, %arg1: i32, %arg2: memref<2xi32, #tpu.memory_space<smem>>) -> (i32, i32, i32, i32) {
    %c0_i32 = arith.constant 0 : i32
    %c0_i32_0 = arith.constant 0 : i32
    %c0_i32_1 = arith.constant 0 : i32
    return %arg0, %arg1, %c0_i32, %c0_i32_0 : i32, i32, i32, i32
  }
  func.func @transform_1(%arg0: i32, %arg1: i32, %arg2: memref<2xi32, #tpu.memory_space<smem>>) -> (i32, i32, i32) {
    %c0_i32 = arith.constant 0 : i32
    %c0_i32_0 = arith.constant 0 : i32
    %c0_i32_1 = arith.constant 0 : i32
    %c0_i32_2 = arith.constant 0 : i32
    return %c0_i32, %c0_i32_0, %c0_i32_1 : i32, i32, i32
  }
  func.func @transform_2(%arg0: i32, %arg1: i32, %arg2: memref<2xi32, #tpu.memory_space<smem>>) -> (i32, i32) {
    %c0_i32 = arith.constant 0 : i32
    %c0_i32_0 = arith.constant 0 : i32
    %c0_i32_1 = arith.constant 0 : i32
    return %c0_i32, %c0_i32_0 : i32, i32
  }
  func.func @transform_3(%arg0: i32, %arg1: i32, %arg2: memref<2xi32, #tpu.memory_space<smem>>) -> (i32, i32, i32) {
    %c0_i32 = arith.constant 0 : i32
    %c0_i32_0 = arith.constant 0 : i32
    return %arg0, %arg1, %c0_i32 : i32, i32, i32
  }
}

module attributes {stable_mosaic.version = 11 : i64} {
  func.func @kernel(%arg0: i32, %arg1: i32, %arg2: memref<2xi32, #tpu.memory_space<smem>>, %arg3: memref<1x1x18x32xbf16, #tpu.memory_space<vmem>>, %arg4: memref<3x32x4xbf16, #tpu.memory_space<vmem>>, %arg5: memref<1x4xf32, #tpu.memory_space<vmem>>, %arg6: memref<1x16x4xf32, #tpu.memory_space<vmem>>) attributes {dimension_semantics = [#tpu.dimension_semantics<parallel>, #tpu.dimension_semantics<parallel>], iteration_bounds = array<i64: 2, 1>, scalar_prefetch = 1 : i64, scratch_operands = 0 : i64, tpu.core_type = #tpu.core_type<tc>, window_params = [{transform_indices = @transform_0, window_bounds = array<i64: 1, 1, 18, 32>}, {pipeline_mode = #tpu.pipeline_mode<synchronous>, transform_indices = @transform_1, window_bounds = array<i64: 3, 32, 4>}, {pipeline_mode = #tpu.pipeline_mode<synchronous>, transform_indices = @transform_2, window_bounds = array<i64: 1, 4>}, {transform_indices = @transform_3, window_bounds = array<i64: 1, 16, 4>}]} {
    %0 = arith.index_cast %arg0 : i32 to index
    %1 = memref.load %arg2[%0] : memref<2xi32, #tpu.memory_space<smem>>
    %c16_i32 = arith.constant 16 : i32
    %2 = arith.muli %arg1, %c16_i32 : i32
    %3 = tpu.iota {dimensions = array<i32: 0>} : vector<18x1xi32>
    %c1_i32 = arith.constant 1 : i32
    %4 = vector.broadcast %c1_i32 : i32 to vector<18x1xi32>
    %5 = arith.subi %3, %4 : vector<18x1xi32>
    %6 = vector.broadcast %2 : i32 to vector<18x1xi32>
    %7 = arith.addi %5, %6 : vector<18x1xi32>
    %c0 = arith.constant 0 : index
    %c0_0 = arith.constant 0 : index
    %c0_1 = arith.constant 0 : index
    %c0_2 = arith.constant 0 : index
    %8 = vector.load %arg3[%c0, %c0_0, %c0_1, %c0_2] : memref<1x1x18x32xbf16, #tpu.memory_space<vmem>>, vector<1x1x18x32xbf16>
    %9 = vector.shape_cast %8 : vector<1x1x18x32xbf16> to vector<18x32xbf16>
    %10 = vector.broadcast %1 : i32 to vector<18x1xi32>
    %11 = arith.cmpi slt, %7, %10 : vector<18x1xi32>
    %12 = arith.extui %11 : vector<18x1xi1> to vector<18x1xi32>
    %13 = arith.sitofp %12 : vector<18x1xi32> to vector<18x1xf32>
    %14 = arith.truncf %13 : vector<18x1xf32> to vector<18x1xbf16>
    %15 = vector.broadcast %14 : vector<18x1xbf16> to vector<18x32xbf16>
    %16 = arith.mulf %9, %15 : vector<18x32xbf16>
    %c0_3 = arith.constant 0 : index
    %c0_4 = arith.constant 0 : index
    %c0_5 = arith.constant 0 : index
    %17 = vector.load %arg4[%c0_3, %c0_4, %c0_5] : memref<3x32x4xbf16, #tpu.memory_space<vmem>>, vector<3x32x4xbf16>
    %18 = vector.extract_strided_slice %16 {offsets = [0, 0], sizes = [16, 32], strides = [1, 1]} : vector<18x32xbf16> to vector<16x32xbf16>
    %19 = vector.extract_strided_slice %17 {offsets = [0, 0, 0], sizes = [1, 32, 4], strides = [1, 1, 1]} : vector<3x32x4xbf16> to vector<1x32x4xbf16>
    %20 = vector.shape_cast %19 : vector<1x32x4xbf16> to vector<32x4xbf16>
    %cst = arith.constant dense<0.000000e+00> : vector<16x4xf32>
    %21 = tpu.matmul %18, %20, %cst {dimension_numbers = #tpu.dot_dimension_numbers<[1], [0], [0], [1], [0, 0, 1, 1], [], []>} : vector<16x32xbf16>, vector<32x4xbf16>, vector<16x4xf32> -> vector<16x4xf32>
    %22 = vector.extract_strided_slice %16 {offsets = [1, 0], sizes = [16, 32], strides = [1, 1]} : vector<18x32xbf16> to vector<16x32xbf16>
    %23 = vector.extract_strided_slice %17 {offsets = [1, 0, 0], sizes = [1, 32, 4], strides = [1, 1, 1]} : vector<3x32x4xbf16> to vector<1x32x4xbf16>
    %24 = vector.shape_cast %23 : vector<1x32x4xbf16> to vector<32x4xbf16>
    %cst_6 = arith.constant dense<0.000000e+00> : vector<16x4xf32>
    %25 = tpu.matmul %22, %24, %cst_6 {dimension_numbers = #tpu.dot_dimension_numbers<[1], [0], [0], [1], [0, 0, 1, 1], [], []>} : vector<16x32xbf16>, vector<32x4xbf16>, vector<16x4xf32> -> vector<16x4xf32>
    %26 = arith.addf %21, %25 : vector<16x4xf32>
    %27 = vector.extract_strided_slice %16 {offsets = [2, 0], sizes = [16, 32], strides = [1, 1]} : vector<18x32xbf16> to vector<16x32xbf16>
    %28 = vector.extract_strided_slice %17 {offsets = [2, 0, 0], sizes = [1, 32, 4], strides = [1, 1, 1]} : vector<3x32x4xbf16> to vector<1x32x4xbf16>
    %29 = vector.shape_cast %28 : vector<1x32x4xbf16> to vector<32x4xbf16>
    %cst_7 = arith.constant dense<0.000000e+00> : vector<16x4xf32>
    %30 = tpu.matmul %27, %29, %cst_7 {dimension_numbers = #tpu.dot_dimension_numbers<[1], [0], [0], [1], [0, 0, 1, 1], [], []>} : vector<16x32xbf16>, vector<32x4xbf16>, vector<16x4xf32> -> vector<16x4xf32>
    %31 = arith.addf %26, %30 : vector<16x4xf32>
    %c0_8 = arith.constant 0 : index
    %c0_9 = arith.constant 0 : index
    %32 = vector.load %arg5[%c0_8, %c0_9] : memref<1x4xf32, #tpu.memory_space<vmem>>, vector<1x4xf32>
    %33 = vector.broadcast %32 : vector<1x4xf32> to vector<16x4xf32>
    %34 = arith.addf %31, %33 : vector<16x4xf32>
    %35 = tpu.iota {dimensions = array<i32: 0>} : vector<16x1xi32>
    %36 = vector.broadcast %2 : i32 to vector<16x1xi32>
    %37 = arith.addi %35, %36 : vector<16x1xi32>
    %38 = vector.broadcast %1 : i32 to vector<16x1xi32>
    %39 = arith.cmpi slt, %37, %38 : vector<16x1xi32>
    %40 = arith.extui %39 : vector<16x1xi1> to vector<16x1xi32>
    %41 = arith.sitofp %40 : vector<16x1xi32> to vector<16x1xf32>
    %42 = vector.broadcast %41 : vector<16x1xf32> to vector<16x4xf32>
    %43 = arith.mulf %34, %42 : vector<16x4xf32>
    %c0_10 = arith.constant 0 : index
    %c0_11 = arith.constant 0 : index
    %c0_12 = arith.constant 0 : index
    %44 = vector.load %arg6[%c0_10, %c0_11, %c0_12] : memref<1x16x4xf32, #tpu.memory_space<vmem>>, vector<1x16x4xf32>
    %45 = vector.shape_cast %44 : vector<1x16x4xf32> to vector<16x4xf32>
    %46 = vector.shape_cast %43 : vector<16x4xf32> to vector<1x16x4xf32>
    tpu.vector_store %arg6[%c0_10, %c0_11, %c0_12], %46 {strides = array<i32>} : memref<1x16x4xf32, #tpu.memory_space<vmem>>, vector<1x16x4xf32>,
    return
  }
  func.func @transform_0(%arg0: i32, %arg1: i32, %arg2: memref<2xi32, #tpu.memory_space<smem>>) -> (i32, i32, i32, i32) {
    %c0_i32 = arith.constant 0 : i32
    %c0_i32_0 = arith.constant 0 : i32
    %c0_i32_1 = arith.constant 0 : i32
    return %arg0, %arg1, %c0_i32, %c0_i32_0 : i32, i32, i32, i32
  }
  func.func @transform_1(%arg0: i32, %arg1: i32, %arg2: memref<2xi32, #tpu.memory_space<smem>>) -> (i32, i32, i32) {
    %c0_i32 = arith.constant 0 : i32
    %c0_i32_0 = arith.constant 0 : i32
    %c0_i32_1 = arith.constant 0 : i32
    %c0_i32_2 = arith.constant 0 : i32
    return %c0_i32, %c0_i32_0, %c0_i32_1 : i32, i32, i32
  }
  func.func @transform_2(%arg0: i32, %arg1: i32, %arg2: memref<2xi32, #tpu.memory_space<smem>>) -> (i32, i32) {
    %c0_i32 = arith.constant 0 : i32
    %c0_i32_0 = arith.constant 0 : i32
    %c0_i32_1 = arith.constant 0 : i32
    return %c0_i32, %c0_i32_0 : i32, i32
  }
  func.func @transform_3(%arg0: i32, %arg1: i32, %arg2: memref<2xi32, #tpu.memory_space<smem>>) -> (i32, i32, i32) {
    %c0_i32 = arith.constant 0 : i32
    %c0_i32_0 = arith.constant 0 : i32
    return %arg0, %arg1, %c0_i32 : i32, i32, i32
  }
}

</mosaic_0001>

<bundles_post_ra>
// kernel: dilated_wn_forward.6
= control target key start
LH: loop header
LB: loop body
LE: loop exit
PB: predicated region body
PF: predicated region fallthrough
CT: control target
= control target key end

     0   :  { %s874_s0 = inlined_call_operand.vmem [shape: s32[2], index: 0, kind: input, shape index: {}]   ;;  %s875_s1 = inlined_call_operand.vmem [shape: bf16[2,1,18,32], index: 1, kind: input, shape index: {}]   ;;  %s876_s2 = inlined_call_operand.vmem [shape: bf16[3,32,32], index: 2, kind: input, shape index: {}]   ;;  %s877_s3 = inlined_call_operand.vmem [shape: f32[1,32], index: 3, kind: input, shape index: {}]   ;;  %s878_s4 = inlined_call_operand.vmem [shape: bf16[2,16,32], index: 4, kind: output, shape index: {}]  }
   0x1   :  { %s9_s17 = sshll.u32 %s874_s0, 4  ;;  %s10_s17 = int_to_ptr.vmem [resolvable:$true] %s9_s17 }
   0x2   :  { %s706_s18 = scalar_lea.vmem %s10_s17, 16  ;;  %p711_p1 = scmp.lt.s32.totalorder %s10_s17, %s10_s17 }
   0x3   :  { %p707_p0 = scmp.ne.s32.totalorder %s10_s17, %s706_s18  ;;  %p712_p2 = scmp.lt.s32.totalorder %s706_s18, %s706_s18 }
   0x5   :  { %p713_p3 = por %p712_p2, %p711_p1 }
   0x7   :  { %p714_p4 = pnand %p713_p3, %p707_p0 }
   0x9   :  { %717 = shalt.err (!%p714_p4)  }
   0xa   :  { %s744_s19 = smov [#allocation3]  }
   0xb   :  { %12 = dma.vmem_to_smem %s10_s17, 16, %s744_s19, [#allocation2] }
   0xc   :  { %730 = dma.done.wait [#allocation2], 16 }
   0xd   :  { %731 = vsyncadd [#allocation2], 4294967280 }
   0xe   :  { %14 = sfence }
   0xf   :  { %s777_s20 = smov 0   ;;  %s779_s21 = smov 0  }
  0x10   :  { %s781_s22 = smov 0  }
  0x11 LB: > { %s32_s0 = sadd.s32 1, %s738_s21  ;;  %p606_p5 = scmp.ge.s32.totalorder %s742_s22, 1  ;;  %s742_s22 = sphi %s781_s22, %s20_s22   ;;  %s738_s21 = sphi %s779_s21, %s880_s21   ;;  %s734_s20 = sphi %s777_s20, %s879_s20  }
  0x12   : > { %p34_p6 = scmp.ge.s32.totalorder %s32_s0, 2  ;;  %p164_p7 = scmp.lt.s32.totalorder %s742_s22, 3 }
  0x14   : > { %s882_s0 = smov (%p34_p6, %s32_s0), 0  ;;  %p165_p8 = pnand %p606_p5, %p164_p7 }
  0x15   : > { %v700_v0 = vld [vmem:[%s876_s2 + $0x10] sm:$0xff] (!%p165_p8)   ;;  %v218_v1 = vlaneseq (!%p165_p8)  ;;  %v745_v2 = vmov (!%p165_p8), 0.0   ;;  %v701_v3 = vld [vmem:[%s876_s2] sm:$0xff] (!%p165_p8)   ;;  %v702_v4 = vld [vmem:[%s876_s2 + $0x18] sm:$0xff] (!%p165_p8)   ;;  %vm746_vm0 = vmmov (!%p165_p8), 0   ;;  %p196_p9 = scmp.lt.s32.totalorder (!%p165_p8), %s734_s20, 1 }
  0x16   : > { %168 = sbr.rel (%p165_p8) target bundleno = 279 (0x117), region = 32  ;;  %646 = vmatprep.subr.bf16.mxu0 (!%p165_p8), %v745_v2  ;;  %654 = vmatprep.subr.bf16.mxu1 (!%p165_p8), %v745_v2  ;;  %v703_v5 = vld [vmem:[%s876_s2 + $0x8] sm:$0xff] (!%p165_p8)   ;;  %s216_s5 = sld [smem:[#allocation3 + %s734_s20]] (!%p165_p8)  ;;  %v747_v7 = vmov (!%p165_p8), 839922192   ;;  %vm318_vm4 = vcmask (!%p165_p8), 261120  }
  0x17   : > { %647 = vmatpush3.bf16.msra.mxu0 (!%p165_p8), %v700_v0  ;;  %650 = vmatprep.mubr.msk.bf16.mxu0 (!%p165_p8), %vm746_vm0, %v745_v2  ;;  %v817_v6 = vshrl.u32 (!%p165_p8), %v218_v1, 7  ;;  %v247_v8 = vunpack.c.l.s4 (!%p165_p8), %v747_v7  ;;  %v748_v9 = vmov (!%p165_p8), 1985246804   ;;  %vm293_vm5 = vsmask.f32 (!%p165_p8), 7424  ;;  %v704_v43 = vld [vmem:[%s876_s2 + $0x20] sm:$0xff] (!%p165_p8)  }
  0x18   : > { %655 = vmatpush3.bf16.msra.mxu1 (!%p165_p8), %v701_v3  ;;  %648 = vmatprep.subr.bf16.mxu0 (!%p165_p8), %v745_v2  ;;  %v254_v10 = vunpack.c.l.s4 (!%p165_p8), %v748_v9  ;;  %v705_v45 = vld [vmem:[%s876_s2 + $0x28] sm:$0xff] (!%p165_p8)   ;;  %vm418_vm6 = vcmask (!%p165_p8), 1046528   ;;  %v627_v60 = vld [vmem:[%s877_s3] ss:$0 sm:$0xff] (!%p165_p8)  ;;  %vm509_vm9 = vcmask (!%p165_p8), 257024  }
  0x19   : > { %656 = vmatprep.subr.bf16.mxu1 (!%p165_p8), %v745_v2  ;;  %658 = vmatprep.mubr.msk.bf16.mxu1 (!%p165_p8), %vm746_vm0, %v745_v2  ;;  %v821_v11 = vadd.s32 (!%p165_p8), 8, %v817_v6  ;;  %v221_v12 = vadd.s32 (!%p165_p8), 16, %v817_v6  ;;  %v610_v13 = vadd.s32 (!%p165_p8), 4294967295, %v817_v6  ;;  %v248_v14 = vunpack.c.0.s8 (!%p165_p8), %v247_v8 }
  0x1a   : > { %v255_v15 = vunpack.c.0.s8 (!%p165_p8), %v254_v10 }
  0x1b   : > { %649 = vmatpush3.bf16.msra.mxu0 (!%p165_p8), %v702_v4  ;;  %v611_v16 = vadd.s32 (!%p165_p8), 4294967295, %v821_v11  ;;  %v612_v17 = vadd.s32 (!%p165_p8), 4294967295, %v221_v12  ;;  %v251_v19 = vsub.s32 (!%p165_p8), %v248_v14, %v817_v6 }
  0x1c   : > { %657 = vmatpush3.bf16.msra.mxu1 (!%p165_p8), %v703_v5  ;;  %662 = vmatprep.subr.bf16.mxu0 (!%p165_p8), %v745_v2  ;;  %v827_v18 = vstv (!%p165_p8), %s216_s5  ;;  %v258_v20 = vsub.s32 (!%p165_p8), %v255_v15, %v817_v6 }
  0x1d   : > { %s884_s20 = smov (!%p196_p9, %s734_s20), 1  ;;  %vm233_vm1 = vcmp.lt.s32.totalorder %v610_v13, %v827_v18  ;;  %vm234_vm2 = vcmp.lt.s32.totalorder %v611_v16, %v827_v18  ;;  %vm235_vm3 = vcmp.lt.s32.totalorder %v612_v17, %v827_v18  ;;  %vm493_vm7 = vcmp.lt.s32.totalorder %v817_v6, %v827_v18 }
  0x1e   : > { %s670_s6 = smul.u32 12, %s884_s20  ;;  %v613_v21 = vsel %vm233_vm1, 1.0, %v745_v2  ;;  %v614_v22 = vsel %vm234_vm2, 1.0, %v745_v2  ;;  %v615_v23 = vsel %vm235_vm3, 1.0, %v745_v2  ;;  %vm494_vm8 = vcmp.lt.s32.totalorder %v821_v11, %v827_v18  ;;  %s634_s16 = sshll.u32 %s884_s20, 3 }
  0x1f   : > { %v242_v24 = vpack.c.bf16 %v614_v22, %v613_v21  ;;  %v243_v25 = vpack.c.bf16 %v615_v23, %v615_v23  ;;  %v628_v4 = vsel %vm493_vm7, 1.0, %v745_v2  ;;  %v629_v8 = vsel %vm494_vm8, 1.0, %v745_v2  ;;  %s213_s19 = scalar_lea.vmem %s878_s4, %s634_s16 }
  0x20   : > { %s204_s9 = scalar_lea.vmem %s875_s1, %s670_s6 }
  0x21   : > { %v229_v26 = vld [vmem:[%s204_s9] sm:$0xf]  ;;  %v230_v27 = vld [vmem:[%s204_s9 + $0x4] sm:$0xf]  ;;  %v231_v28 = vld [vmem:[%s204_s9 + $0x8] sm:$0x1]  ;;  %v252_v29 = vrot.slane %v242_v24, %v251_v19  ;;  %v259_v30 = vrot.slane %v242_v24, %v258_v20  ;;  %v266_v31 = vrot.slane %v243_v25, %v251_v19 }
  0x23   : > { %v270_v32 = vmul.bf16 %v252_v29, %v229_v26  ;;  %v271_v33 = vmul.bf16 %v259_v30, %v230_v27  ;;  %v272_v34 = vmul.bf16 %v266_v31, %v231_v28 }
  0x25   : > { %v616_v35 = vcombine.low %v270_v32, %v271_v33  ;;  %v617_v36 = vcombine.low %v272_v34, %v272_v34 }
  0x27   : > { %v295_v37 = vshrl.u32 %v616_v35, 16  ;;  %v297_v38 = vshll.u32 %v616_v35, 16  ;;  %v302_v39 = vshll.u32 %v617_v36, 16  ;;  %659 = vmatmul.mubr.msk.bf16.vlgmr.msra.gmra.mrb[0].mxu1 %vm318_vm4, %v616_v35  ;;  %v419_v46 = vrot.slane %v616_v35, 1 }
  0x28   : > { %v420_v47 = vrot.slane %v617_v36, 1 }
  0x29   : > { %v299_v40 = vrot.slane %v297_v38, 1  ;;  %v304_v41 = vrot.slane %v302_v39, 1 }
  0x2a   : > { %v421_v48 = vsel %vm418_vm6, %v419_v46, %v420_v47 }
  0x2b   : > { %v300_v42 = vor.u32 %v299_v40, %v295_v37 }
  0x2d   : > { %v305_v44 = vsel %vm293_vm5, %v300_v42, %v304_v41 }
  0x2e   : > { %651 = vmatmul.mubr.msk.bf16.vlgmr.msra.gmra.mrb[0].mxu0 %vm318_vm4, %v305_v44 }
  0x2f   : > { %663 = vmatpush3.bf16.msra.mxu0 %v704_v43  ;;  %666 = vmatprep.mubr.msk.bf16.mxu0 %vm746_vm0, %v745_v2 }
  0x30   : > { %664 = vmatprep.subr.bf16.mxu0 %v745_v2 }
  0x33   : > { %665 = vmatpush3.bf16.msra.mxu0 %v705_v45 }
  0x36   : > { %667 = vmatmul.mubr.msk.bf16.vlgmr.msra.gmra.mrb[4].mxu0 %vm318_vm4, %v421_v48 }
  0xfa   : > { %v411_v49 = vpop.f32.mrb[0].mxu1 }
  0xfb   : > { %v660_v50 = vpop.f32.mrb[1].mxu1 }
  0xfc   : > { %v414_v51 = vpop.f32.mrb[2].mxu1 }
  0xfd   : > { %v661_v52 = vpop.f32.mrb[3].mxu1 }
 0x101   : > { %v356_v53 = vpop.f32.mrb[0].mxu0 }
 0x102   : > { %v412_v54 = vadd.f32 %v411_v49, %v356_v53  ;;  %v652_v55 = vpop.f32.mrb[1].mxu0 }
 0x103   : > { %v359_v56 = vpop.f32.mrb[2].mxu0 }
 0x104   : > { %v415_v57 = vadd.f32 %v414_v51, %v359_v56  ;;  %v653_v58 = vpop.f32.mrb[3].mxu0 }
 0x109   : > { %v471_v59 = vpop.f32.mrb[4].mxu0 }
 0x10a   : > { %v478_v61 = vadd.f32 %v471_v59, %v412_v54  ;;  %v668_v62 = vpop.f32.mrb[5].mxu0 }
 0x10b   : > { %v474_v63 = vpop.f32.mrb[6].mxu0 }
 0x10c   : > { %v487_v0 = vadd.f32 %v627_v60, %v478_v61  ;;  %v479_v1 = vadd.f32 %v474_v63, %v415_v57  ;;  %v669_v3 = vpop.f32.mrb[7].mxu0 }
 0x10e   : > { %v489_v5 = vmax.f32 %v487_v0, 0.0  ;;  %v488_v7 = vadd.f32 %v627_v60, %v479_v1 }
 0x110   : > { %v499_v9 = vmul.f32 %v628_v4, %v489_v5  ;;  %v490_v10 = vmax.f32 %v488_v7, 0.0 }
 0x112   : > { %v635_v6 = vpack.c.bf16 %v499_v9, %v499_v9  ;;  %v500_v12 = vmul.f32 %v629_v8, %v490_v10 }
 0x114   : > { %510 = vst.msk [vmem:[%s213_s19] sm:$0xf] %vm509_vm9, %v635_v6  ;;  %v636_v13 = vpack.c.bf16 %v500_v12, %v500_v12 }
 0x116   : > { %511 = vst.msk [vmem:[%s213_s19 + $0x4] sm:$0xf] %vm509_vm9, %v636_v13 }
 0x117 PF: > { %s20_s22 = sadd.s32 1, %s742_s22   ;;  %s879_s20 = smov %s738_s21 }
 0x118   : > { %p17_p10 = scmp.ge.s32.totalorder %s20_s22, 4   ;;  %s880_s21 = smov %s882_s0 }
 0x11a   :  { %19 = sbr.rel (!%p17_p10) target bundleno = 17 (0x11), region = 62 }

// kernel: dilated_wn_forward.7
= control target key start
LH: loop header
LB: loop body
LE: loop exit
PB: predicated region body
PF: predicated region fallthrough
CT: control target
= control target key end

     0   :  { %s860_s0 = inlined_call_operand.vmem [shape: s32[2], index: 0, kind: input, shape index: {}]   ;;  %s861_s1 = inlined_call_operand.vmem [shape: bf16[2,1,18,32], index: 1, kind: input, shape index: {}]   ;;  %s862_s2 = inlined_call_operand.vmem [shape: bf16[3,32,4], index: 2, kind: input, shape index: {}]   ;;  %s863_s3 = inlined_call_operand.vmem [shape: f32[1,4], index: 3, kind: input, shape index: {}]   ;;  %s864_s4 = inlined_call_operand.vmem [shape: f32[2,16,4], index: 4, kind: output, shape index: {}]  }
   0x1   :  { %s9_s17 = sshll.u32 %s860_s0, 4  ;;  %s10_s17 = int_to_ptr.vmem [resolvable:$true] %s9_s17 }
   0x2   :  { %s692_s18 = scalar_lea.vmem %s10_s17, 16  ;;  %p697_p1 = scmp.lt.s32.totalorder %s10_s17, %s10_s17 }
   0x3   :  { %p693_p0 = scmp.ne.s32.totalorder %s10_s17, %s692_s18  ;;  %p698_p2 = scmp.lt.s32.totalorder %s692_s18, %s692_s18 }
   0x5   :  { %p699_p3 = por %p698_p2, %p697_p1 }
   0x7   :  { %p700_p4 = pnand %p699_p3, %p693_p0 }
   0x9   :  { %703 = shalt.err (!%p700_p4)  }
   0xa   :  { %s730_s19 = smov [#allocation3]  }
   0xb   :  { %12 = dma.vmem_to_smem %s10_s17, 16, %s730_s19, [#allocation2] }
   0xc   :  { %716 = dma.done.wait [#allocation2], 16 }
   0xd   :  { %717 = vsyncadd [#allocation2], 4294967280 }
   0xe   :  { %14 = sfence }
   0xf   :  { %s763_s20 = smov 0   ;;  %s765_s21 = smov 0  }
  0x10   :  { %s767_s22 = smov 0  }
  0x11 LB: > { %s32_s0 = sadd.s32 1, %s724_s21  ;;  %p596_p5 = scmp.ge.s32.totalorder %s728_s22, 1  ;;  %s728_s22 = sphi %s767_s22, %s20_s22   ;;  %s724_s21 = sphi %s765_s21, %s866_s21   ;;  %s720_s20 = sphi %s763_s20, %s865_s20  }
  0x12   : > { %p34_p6 = scmp.ge.s32.totalorder %s32_s0, 2  ;;  %p164_p7 = scmp.lt.s32.totalorder %s728_s22, 3 }
  0x14   : > { %s868_s0 = smov (%p34_p6, %s32_s0), 0  ;;  %p165_p8 = pnand %p596_p5, %p164_p7 }
  0x15   : > { %v686_v0 = vld [vmem:[%s862_s2 + $0x10] sm:$0xff] (!%p165_p8)   ;;  %v218_v1 = vlaneseq (!%p165_p8)  ;;  %v731_v2 = vmov (!%p165_p8), 0.0   ;;  %v687_v3 = vld [vmem:[%s862_s2] sm:$0xff] (!%p165_p8)   ;;  %v688_v4 = vld [vmem:[%s862_s2 + $0x18] sm:$0xff] (!%p165_p8)   ;;  %vm732_vm0 = vmmov (!%p165_p8), 0   ;;  %p196_p9 = scmp.lt.s32.totalorder (!%p165_p8), %s720_s20, 1 }
  0x16   : > { %168 = sbr.rel (%p165_p8) target bundleno = 275 (0x113), region = 32  ;;  %632 = vmatprep.subr.bf16.mxu0 (!%p165_p8), %v731_v2  ;;  %640 = vmatprep.subr.bf16.mxu1 (!%p165_p8), %v731_v2  ;;  %v689_v5 = vld [vmem:[%s862_s2 + $0x8] sm:$0xff] (!%p165_p8)   ;;  %s216_s5 = sld [smem:[#allocation3 + %s720_s20]] (!%p165_p8)  ;;  %v733_v7 = vmov (!%p165_p8), 839922192   ;;  %vm318_vm4 = vcmask (!%p165_p8), 261120  }
  0x17   : > { %633 = vmatpush3.bf16.msra.mxu0 (!%p165_p8), %v686_v0  ;;  %636 = vmatprep.mubr.msk.bf16.mxu0 (!%p165_p8), %vm732_vm0, %v731_v2  ;;  %v803_v6 = vshrl.u32 (!%p165_p8), %v218_v1, 7  ;;  %v247_v8 = vunpack.c.l.s4 (!%p165_p8), %v733_v7  ;;  %v734_v9 = vmov (!%p165_p8), 1985246804   ;;  %vm293_vm5 = vsmask.f32 (!%p165_p8), 7424  ;;  %v690_v43 = vld [vmem:[%s862_s2 + $0x20] sm:$0xff] (!%p165_p8)  }
  0x18   : > { %641 = vmatpush3.bf16.msra.mxu1 (!%p165_p8), %v687_v3  ;;  %634 = vmatprep.subr.bf16.mxu0 (!%p165_p8), %v731_v2  ;;  %v254_v10 = vunpack.c.l.s4 (!%p165_p8), %v734_v9  ;;  %v691_v45 = vld [vmem:[%s862_s2 + $0x28] sm:$0xff] (!%p165_p8)   ;;  %vm418_vm6 = vcmask (!%p165_p8), 1046528   ;;  %v617_v60 = vld [vmem:[%s863_s3] ss:$0 sm:$0xff] (!%p165_p8)  ;;  %vm499_vm9 = vcmask (!%p165_p8), 31744  }
  0x19   : > { %642 = vmatprep.subr.bf16.mxu1 (!%p165_p8), %v731_v2  ;;  %644 = vmatprep.mubr.msk.bf16.mxu1 (!%p165_p8), %vm732_vm0, %v731_v2  ;;  %v807_v11 = vadd.s32 (!%p165_p8), 8, %v803_v6  ;;  %v221_v12 = vadd.s32 (!%p165_p8), 16, %v803_v6  ;;  %v600_v13 = vadd.s32 (!%p165_p8), 4294967295, %v803_v6  ;;  %v248_v14 = vunpack.c.0.s8 (!%p165_p8), %v247_v8 }
  0x1a   : > { %v255_v15 = vunpack.c.0.s8 (!%p165_p8), %v254_v10 }
  0x1b   : > { %635 = vmatpush3.bf16.msra.mxu0 (!%p165_p8), %v688_v4  ;;  %v601_v16 = vadd.s32 (!%p165_p8), 4294967295, %v807_v11  ;;  %v602_v17 = vadd.s32 (!%p165_p8), 4294967295, %v221_v12  ;;  %v251_v19 = vsub.s32 (!%p165_p8), %v248_v14, %v803_v6 }
  0x1c   : > { %643 = vmatpush3.bf16.msra.mxu1 (!%p165_p8), %v689_v5  ;;  %648 = vmatprep.subr.bf16.mxu0 (!%p165_p8), %v731_v2  ;;  %v813_v18 = vstv (!%p165_p8), %s216_s5  ;;  %v258_v20 = vsub.s32 (!%p165_p8), %v255_v15, %v803_v6 }
  0x1d   : > { %s870_s20 = smov (!%p196_p9, %s720_s20), 1  ;;  %vm233_vm1 = vcmp.lt.s32.totalorder %v600_v13, %v813_v18  ;;  %vm234_vm2 = vcmp.lt.s32.totalorder %v601_v16, %v813_v18  ;;  %vm235_vm3 = vcmp.lt.s32.totalorder %v602_v17, %v813_v18  ;;  %vm491_vm7 = vcmp.lt.s32.totalorder %v803_v6, %v813_v18 }
  0x1e   : > { %s656_s6 = smul.u32 12, %s870_s20  ;;  %v603_v21 = vsel %vm233_vm1, 1.0, %v731_v2  ;;  %v604_v22 = vsel %vm234_vm2, 1.0, %v731_v2  ;;  %v605_v23 = vsel %vm235_vm3, 1.0, %v731_v2  ;;  %s622_s16 = sshll.u32 %s870_s20, 4  ;;  %vm492_vm8 = vcmp.lt.s32.totalorder %v807_v11, %v813_v18 }
  0x1f   : > { %v242_v24 = vpack.c.bf16 %v604_v22, %v603_v21  ;;  %v243_v25 = vpack.c.bf16 %v605_v23, %v605_v23  ;;  %v618_v63 = vsel %vm491_vm7, 1.0, %v731_v2  ;;  %s213_s19 = scalar_lea.vmem %s864_s4, %s622_s16  ;;  %v619_v5 = vsel %vm492_vm8, 1.0, %v731_v2 }
  0x20   : > { %s204_s9 = scalar_lea.vmem %s861_s1, %s656_s6 }
  0x21   : > { %v229_v26 = vld [vmem:[%s204_s9] sm:$0xf]  ;;  %v230_v27 = vld [vmem:[%s204_s9 + $0x4] sm:$0xf]  ;;  %v231_v28 = vld [vmem:[%s204_s9 + $0x8] sm:$0x1]  ;;  %v252_v29 = vrot.slane %v242_v24, %v251_v19  ;;  %v259_v30 = vrot.slane %v242_v24, %v258_v20  ;;  %v266_v31 = vrot.slane %v243_v25, %v251_v19 }
  0x23   : > { %v270_v32 = vmul.bf16 %v252_v29, %v229_v26  ;;  %v271_v33 = vmul.bf16 %v259_v30, %v230_v27  ;;  %v272_v34 = vmul.bf16 %v266_v31, %v231_v28 }
  0x25   : > { %v606_v35 = vcombine.low %v270_v32, %v271_v33  ;;  %v607_v36 = vcombine.low %v272_v34, %v272_v34 }
  0x27   : > { %v295_v37 = vshrl.u32 %v606_v35, 16  ;;  %v297_v38 = vshll.u32 %v606_v35, 16  ;;  %v302_v39 = vshll.u32 %v607_v36, 16  ;;  %645 = vmatmul.mubr.msk.bf16.vlgmr.msra.gmra.mrb[0].mxu1 %vm318_vm4, %v606_v35  ;;  %v419_v46 = vrot.slane %v606_v35, 1 }
  0x28   : > { %v420_v47 = vrot.slane %v607_v36, 1 }
  0x29   : > { %v299_v40 = vrot.slane %v297_v38, 1  ;;  %v304_v41 = vrot.slane %v302_v39, 1 }
  0x2a   : > { %v421_v48 = vsel %vm418_vm6, %v419_v46, %v420_v47 }
  0x2b   : > { %v300_v42 = vor.u32 %v299_v40, %v295_v37 }
  0x2d   : > { %v305_v44 = vsel %vm293_vm5, %v300_v42, %v304_v41 }
  0x2e   : > { %637 = vmatmul.mubr.msk.bf16.vlgmr.msra.gmra.mrb[0].mxu0 %vm318_vm4, %v305_v44 }
  0x2f   : > { %649 = vmatpush3.bf16.msra.mxu0 %v690_v43  ;;  %652 = vmatprep.mubr.msk.bf16.mxu0 %vm732_vm0, %v731_v2 }
  0x30   : > { %650 = vmatprep.subr.bf16.mxu0 %v731_v2 }
  0x33   : > { %651 = vmatpush3.bf16.msra.mxu0 %v691_v45 }
  0x36   : > { %653 = vmatmul.mubr.msk.bf16.vlgmr.msra.gmra.mrb[4].mxu0 %vm318_vm4, %v421_v48 }
  0xfa   : > { %v411_v49 = vpop.f32.mrb[0].mxu1 }
  0xfb   : > { %v646_v50 = vpop.f32.mrb[1].mxu1 }
  0xfc   : > { %v414_v51 = vpop.f32.mrb[2].mxu1 }
  0xfd   : > { %v647_v52 = vpop.f32.mrb[3].mxu1 }
 0x101   : > { %v356_v53 = vpop.f32.mrb[0].mxu0 }
 0x102   : > { %v412_v54 = vadd.f32 %v411_v49, %v356_v53  ;;  %v638_v55 = vpop.f32.mrb[1].mxu0 }
 0x103   : > { %v359_v56 = vpop.f32.mrb[2].mxu0 }
 0x104   : > { %v415_v57 = vadd.f32 %v414_v51, %v359_v56  ;;  %v639_v58 = vpop.f32.mrb[3].mxu0 }
 0x109   : > { %v471_v59 = vpop.f32.mrb[4].mxu0 }
 0x10a   : > { %v478_v61 = vadd.f32 %v471_v59, %v412_v54  ;;  %v654_v62 = vpop.f32.mrb[5].mxu0 }
 0x10b   : > { %v474_v0 = vpop.f32.mrb[6].mxu0 }
 0x10c   : > { %v487_v1 = vadd.f32 %v617_v60, %v478_v61  ;;  %v479_v3 = vadd.f32 %v474_v0, %v415_v57  ;;  %v655_v4 = vpop.f32.mrb[7].mxu0 }
 0x10e   : > { %v497_v6 = vmul.f32 %v618_v63, %v487_v1  ;;  %v488_v7 = vadd.f32 %v617_v60, %v479_v3 }
 0x110   : > { %500 = vst.msk [vmem:[%s213_s19] sm:$0xff] %vm499_vm9, %v497_v6  ;;  %v498_v8 = vmul.f32 %v619_v5, %v488_v7 }
 0x112   : > { %501 = vst.msk [vmem:[%s213_s19 + $0x8] sm:$0xff] %vm499_vm9, %v498_v8 }
 0x113 PF: > { %s20_s22 = sadd.s32 1, %s728_s22   ;;  %s865_s20 = smov %s724_s21 }
 0x114   : > { %p17_p10 = scmp.ge.s32.totalorder %s20_s22, 4   ;;  %s866_s21 = smov %s868_s0 }
 0x116   :  { %19 = sbr.rel (!%p17_p10) target bundleno = 17 (0x11), region = 62 }

// kernel: dilated_wn_forward.4
= control target key start
LH: loop header
LB: loop body
LE: loop exit
PB: predicated region body
PF: predicated region fallthrough
CT: control target
= control target key end

     0   :  { %s872_s0 = inlined_call_operand.vmem [shape: s32[2], index: 0, kind: input, shape index: {}]   ;;  %s873_s1 = inlined_call_operand.vmem [shape: f32[2,1,18,4], index: 1, kind: input, shape index: {}]   ;;  %s874_s2 = inlined_call_operand.vmem [shape: bf16[3,4,32], index: 2, kind: input, shape index: {}]   ;;  %s875_s3 = inlined_call_operand.hbm [shape: f32[1,32], index: 3, kind: input, shape index: {}]   ;;  %s876_s4 = inlined_call_operand.vmem [shape: bf16[2,16,32], index: 4, kind: output, shape index: {}]  }
   0x1   :  { %s9_s17 = sshll.u32 %s872_s0, 4  ;;  %s10_s17 = int_to_ptr.vmem [resolvable:$true] %s9_s17 }
   0x2   :  { %s650_s18 = scalar_lea.vmem %s10_s17, 16  ;;  %p655_p1 = scmp.lt.s32.totalorder %s10_s17, %s10_s17 }
   0x3   :  { %p651_p0 = scmp.ne.s32.totalorder %s10_s17, %s650_s18  ;;  %p656_p2 = scmp.lt.s32.totalorder %s650_s18, %s650_s18 }
   0x5   :  { %p657_p3 = por %p656_p2, %p655_p1 }
   0x7   :  { %p658_p4 = pnand %p657_p3, %p651_p0 }
   0x9   :  { %661 = shalt.err (!%p658_p4)  }
   0xa   :  { %s720_s19 = smov [#allocation3]  }
   0xb   :  { %12 = dma.vmem_to_smem %s10_s17, 16, %s720_s19, [#allocation2] }
   0xc   :  { %702 = dma.done.wait [#allocation2], 16 }
   0xd   :  { %703 = vsyncadd [#allocation2], 4294967280 }
   0xe   :  { %14 = sfence }
   0xf   :  { %15 = vsyncpa [#allocation5], 0  ;;  %s752_s20 = smov 0   ;;  %s754_s21 = smov 0  }
  0x10   :  { %s756_s22 = smov 0  }
  0x11 LB: > { %s558_s0 = sadd.s32 4294967295, %s718_s22   ;;  %s33_s23 = sadd.s32 1, %s714_s21  ;;  %s718_s22 = sphi %s756_s22, %s21_s22   ;;  %s714_s21 = sphi %s754_s21, %s886_s21   ;;  %s710_s20 = sphi %s752_s20, %s885_s20  }
  0x12   : > { %p35_p5 = scmp.ge.s32.totalorder %s33_s23, 2  ;;  %p560_p6 = scmp.ge.s32.totalorder %s718_s22, 1 }
  0x13   : > { %p136_p7 = scmp.lt.s32.totalorder %s718_s22, 3  ;;  %p777_p9 = scmp.eq.s32.totalorder %s558_s0, 0 }
  0x14   : > { %s888_s23 = smov (%p35_p5, %s33_s23), 0  ;;  %s721_s26 = smov [#allocation4]  }
  0x15   : > { %p773_p8 = pnand %p560_p6, %p136_p7  ;;  %s152_s27 = sshll.u32 %s721_s26, 4  ;;  %s153_s27 = int_to_ptr.vmem [resolvable:$true] %s152_s27 }
  0x16   : > { %s881_s25 = scalar_select %p777_p9, 1, 0 }
  0x17   : > { %s880_s24 = scalar_select %p773_p8, 1, 0 }
  0x18   : > { %p616_p10 = pneg %p773_p8  ;;  %s662_s5 = scalar_lea.hbm %s875_s3, 16 }
  0x19   : > { %p663_p12 = scmp.ne.s32.totalorder %s875_s3, %s662_s5  ;;  %p669_p2 = scmp.lt.u32.totalorder %s662_s5, %s875_s3 }
  0x1a   : > { %p785_p11 = pnand %p777_p9, %p616_p10 }
  0x1c   : > { %p664_p13 = pneg %p785_p11 }
  0x1e   : > { %p665_p0 = pnand %p664_p13, %p663_p12 }
  0x20   : > { %p666_p1 = pneg %p665_p0 }
  0x22   : > { %p671_p3 = pnand %p669_p2, %p666_p1 }
  0x24   : > { %674 = shalt.err (!%p671_p3)
}
  0x25   : > { %s675_s10 = scalar_lea.vmem %s153_s27, 16  ;;  %s682_s11 = scalar_lea.vmem %s153_s27, 32 }
  0x26   : > { %p676_p4 = scmp.ne.s32.totalorder %s153_s27, %s675_s10  ;;  %p683_p7 = scmp.lt.s32.totalorder %s153_s27, %s153_s27 }
  0x27   : > { %p684_p10 = scmp.lt.s32.totalorder %s682_s11, %s675_s10 }
  0x28   : > { %p678_p5 = pnand %p676_p4, %p664_p13 }
  0x29   : > { %p685_p9 = por %p684_p10, %p683_p7 }
  0x2a   : > { %p679_p6 = pneg %p678_p5 }
  0x2c   : > { %p686_p8 = pnand %p685_p9, %p679_p6 }
  0x2e   : > { %689 = shalt.err (!%p686_p8)
}
  0x2f   : > { %619 = dma.hbm_to_vmem [thread:$0]  (!%p785_p11), %s875_s3, 16, %s153_s27, [#allocation5]  }
  0x30   : > { %p883_p12 = scmp.ne.s32.totalorder %s880_s24, 0 }
  0x31   : > { %p884_p0 = scmp.ne.s32.totalorder (!%p883_p12), %s881_s25, 0 }
  0x32   : > { %177 = sbr.rel (%p883_p12) target bundleno = 310 (0x136), region = 32 }
  0x39   : > { %705 = dma.done.wait (%p884_p0), [#allocation5], 16  }
  0x3a   : > { %707 = vsyncadd (%p884_p0), [#allocation5], 4294967280  ;;  %p209_p9 = scmp.lt.s32.totalorder %s710_s20, 1  ;;  %v231_v0 = vlaneseq  ;;  %v722_v1 = vmov 0.0   ;;  %s229_s14 = sld [smem:[#allocation3 + %s710_s20]]  ;;  %vm723_vm0 = vmmov 0  }
  0x3b   : > { %593 = vmatprep.subr.bf16.mxu0 %v722_v1  ;;  %599 = vmatprep.subr.bf16.mxu1 %v722_v1  ;;  %vm280_vm1 = vcmask 1041408   ;;  %v261_v8 = vld [vmem:[%s874_s2 + $0x2] sm:$0x3]  ;;  %v260_v9 = vld [vmem:[%s874_s2] sm:$0x3]  ;;  %vm276_vm5 = vcmask 31744  }
  0x3c   : > { %595 = vmatprep.mubr.msk.bf16.mxu0 %vm723_vm0, %v722_v1  ;;  %601 = vmatprep.mubr.msk.bf16.mxu1 %vm723_vm0, %v722_v1  ;;  %s890_s20 = smov (!%p209_p9, %s710_s20), 1  ;;  %v822_v2 = vshrl.u32 %v231_v0, 7  ;;  %v282_v12 = vsel %vm280_vm1, %v261_v8, 0  ;;  %v328_v13 = vsel %vm280_vm1, %v260_v9, 0  ;;  %v262_v28 = vld [vmem:[%s874_s2 + $0x4] sm:$0x3] }
  0x3d   : > { %s611_s15 = smul.u32 24, %s890_s20  ;;  %594 = vmatpush3.bf16.msra.mxu0 %v282_v12  ;;  %600 = vmatpush3.bf16.msra.mxu1 %v328_v13  ;;  %vm263_vm6 = vsmask.f32 7424  ;;  %v381_v31 = vsel %vm280_vm1, %v262_v28, 0  ;;  %vm373_vm7 = vcmask 1046528   ;;  %s584_s28 = sshll.u32 %s890_s20, 3 }
  0x3e   : > { %v826_v3 = vadd.s32 8, %v822_v2  ;;  %v234_v4 = vadd.s32 16, %v822_v2  ;;  %v568_v5 = vadd.s32 4294967295, %v822_v2  ;;  %605 = vmatprep.subr.bf16.mxu0 %v722_v1  ;;  %v577_v47 = vld [vmem:[#allocation4] ss:$0 sm:$0xff]  ;;  %s226_s5 = scalar_lea.vmem %s876_s4, %s584_s28  ;;  %vm453_vm10 = vcmask 257024  }
  0x3f   : > { %s217_s18 = scalar_lea.vmem %s873_s1, %s611_s15 }
  0x40   : > { %v569_v6 = vadd.s32 4294967295, %v826_v3  ;;  %v570_v7 = vadd.s32 4294967295, %v234_v4  ;;  %v242_v10 = vld [vmem:[%s217_s18] sm:$0xff]  ;;  %v245_v11 = vstv %s229_s14  ;;  %v243_v14 = vld [vmem:[%s217_s18 + $0x8] sm:$0xff]  ;;  %v244_v15 = vld [vmem:[%s217_s18 + $0x10] sm:$0x3] }
  0x41   : > { %vm246_vm2 = vcmp.lt.s32.totalorder %v568_v5, %v245_v11  ;;  %vm437_vm8 = vcmp.lt.s32.totalorder %v822_v2, %v245_v11  ;;  %vm438_vm9 = vcmp.lt.s32.totalorder %v826_v3, %v245_v11 }
  0x42   : > { %vm247_vm3 = vcmp.lt.s32.totalorder %v569_v6, %v245_v11  ;;  %vm248_vm4 = vcmp.lt.s32.totalorder %v570_v7, %v245_v11  ;;  %v571_v16 = vsel %vm246_vm2, 1.0, %v722_v1  ;;  %v578_v50 = vsel %vm437_vm8, 1.0, %v722_v1 }
  0x43   : > { %v572_v17 = vsel %vm247_vm3, 1.0, %v722_v1  ;;  %v573_v18 = vsel %vm248_vm4, 1.0, %v722_v1  ;;  %v255_v19 = vmul.f32 %v571_v16, %v242_v10  ;;  %v579_v55 = vsel %vm438_vm9, 1.0, %v722_v1 }
  0x44   : > { %v256_v20 = vmul.f32 %v572_v17, %v243_v14  ;;  %v257_v21 = vmul.f32 %v573_v18, %v244_v15 }
  0x46   : > { %v258_v22 = vpack.c.bf16 %v256_v20, %v255_v19  ;;  %v259_v23 = vpack.c.bf16 %v257_v21, %v257_v21 }
  0x48   : > { %v265_v24 = vshrl.u32 %v258_v22, 16  ;;  %v267_v25 = vshll.u32 %v258_v22, 16  ;;  %602 = vmatmul.mubr.msk.bf16.vlgmr.msra.gmra.mrb[0].mxu1 %vm276_vm5, %v258_v22  ;;  %v272_v26 = vshll.u32 %v259_v23, 16  ;;  %v374_v33 = vrot.slane %v258_v22, 1 }
  0x49   : > { %v375_v34 = vrot.slane %v259_v23, 1 }
  0x4a   : > { %v269_v27 = vrot.slane %v267_v25, 1  ;;  %v274_v29 = vrot.slane %v272_v26, 1 }
  0x4b   : > { %v376_v35 = vsel %vm373_vm7, %v374_v33, %v375_v34 }
  0x4c   : > { %v270_v30 = vor.u32 %v269_v27, %v265_v24 }
  0x4e   : > { %v275_v32 = vsel %vm263_vm6, %v270_v30, %v274_v29 }
  0x4f   : > { %596 = vmatmul.mubr.msk.bf16.vlgmr.msra.gmra.mrb[0].mxu0 %vm276_vm5, %v275_v32 }
  0x50   : > { %606 = vmatpush3.bf16.msra.mxu0 %v381_v31  ;;  %607 = vmatprep.mubr.msk.bf16.mxu0 %vm723_vm0, %v722_v1 }
  0x57   : > { %608 = vmatmul.mubr.msk.bf16.vlgmr.msra.gmra.mrb[4].mxu0 %vm276_vm5, %v376_v35 }
 0x11b   : > { %v364_v36 = vpop.f32.mrb[0].mxu1 }
 0x11c   : > { %v603_v37 = vpop.f32.mrb[1].mxu1 }
 0x11d   : > { %v367_v38 = vpop.f32.mrb[2].mxu1 }
 0x11e   : > { %v604_v39 = vpop.f32.mrb[3].mxu1 }
 0x122   : > { %v318_v40 = vpop.f32.mrb[0].mxu0 }
 0x123   : > { %v365_v41 = vadd.f32 %v364_v36, %v318_v40  ;;  %v597_v42 = vpop.f32.mrb[1].mxu0 }
 0x124   : > { %v321_v43 = vpop.f32.mrb[2].mxu0 }
 0x125   : > { %v368_v44 = vadd.f32 %v367_v38, %v321_v43  ;;  %v598_v45 = vpop.f32.mrb[3].mxu0 }
 0x12a   : > { %v417_v46 = vpop.f32.mrb[4].mxu0 }
 0x12b   : > { %v424_v48 = vadd.f32 %v417_v46, %v365_v41  ;;  %v609_v49 = vpop.f32.mrb[5].mxu0 }
 0x12c   : > { %v420_v51 = vpop.f32.mrb[6].mxu0 }
 0x12d   : > { %v433_v52 = vadd.f32 %v577_v47, %v424_v48  ;;  %v425_v53 = vadd.f32 %v420_v51, %v368_v44  ;;  %v610_v54 = vpop.f32.mrb[7].mxu0 }
 0x12f   : > { %v443_v56 = vmul.f32 %v578_v50, %v433_v52  ;;  %v434_v57 = vadd.f32 %v577_v47, %v425_v53 }
 0x131   : > { %v585_v58 = vpack.c.bf16 %v443_v56, %v443_v56  ;;  %v444_v59 = vmul.f32 %v579_v55, %v434_v57 }
 0x133   : > { %454 = vst.msk [vmem:[%s226_s5] sm:$0xf] %vm453_vm10, %v585_v58  ;;  %v586_v60 = vpack.c.bf16 %v444_v59, %v444_v59 }
 0x135   : > { %455 = vst.msk [vmem:[%s226_s5 + $0x4] sm:$0xf] %vm453_vm10, %v586_v60 }
 0x136 PF: > { %s21_s22 = sadd.s32 1, %s718_s22   ;;  %s885_s20 = smov %s714_s21 }
 0x137   : > { %p18_p8 = scmp.ge.s32.totalorder %s21_s22, 4   ;;  %s886_s21 = smov %s888_s23 }
 0x139   :  { %20 = sbr.rel (!%p18_p8) target bundleno = 17 (0x11), region = 67 }
 0x140   :  { %486 = vsyncpa [#allocation5], 1 }
 0x141   :  { %488 = vsyncpa [#allocation5 + $0x1], 1 }

// kernel: dilated_wn_forward.5
= control target key start
LH: loop header
LB: loop body
LE: loop exit
PB: predicated region body
PF: predicated region fallthrough
CT: control target
= control target key end

     0   :  { %s1526_s0 = inlined_call_operand.vmem [shape: s32[2], index: 0, kind: input, shape index: {}]   ;;  %s1527_s1 = inlined_call_operand.vmem [shape: bf16[2,16,32], index: 1, kind: input, shape index: {}]   ;;  %s1528_s2 = inlined_call_operand.vmem [shape: bf16[2,16,24], index: 2, kind: input, shape index: {}]   ;;  %s1529_s3 = inlined_call_operand.vmem [shape: bf16[4,32,32], index: 3, kind: input, shape index: {}]   ;;  %s1530_s4 = inlined_call_operand.vmem [shape: bf16[4,32,32], index: 4, kind: input, shape index: {}]   ;;  %s1531_s5 = inlined_call_operand.vmem [shape: bf16[4,24,32], index: 5, kind: input, shape index: {}]   ;;  %s1532_s6 = inlined_call_operand.vmem [shape: bf16[4,24,32], index: 6, kind: input, shape index: {}]   ;;  %s1533_s7 = inlined_call_operand.vmem [shape: bf16[4,32,32], index: 7, kind: input, shape index: {}]   ;;  %s1534_s8 = inlined_call_operand.vmem [shape: bf16[4,32,32], index: 8, kind: input, shape index: {}]   ;;  %s1535_s9 = inlined_call_operand.vmem [shape: f32[4,4,32], index: 9, kind: input, shape index: {}]   ;;  %s1536_s10 = inlined_call_operand.vmem [shape: bf16[2,16,32], index: 10, kind: output, shape index: {}]  }
   0x1   :  { %s15_s15 = sshll.u32 %s1526_s0, 4  ;;  %s16_s15 = int_to_ptr.vmem [resolvable:$true] %s15_s15 }
   0x2   :  { %s1228_s16 = scalar_lea.vmem %s16_s15, 16  ;;  %p1233_p1 = scmp.lt.s32.totalorder %s16_s15, %s16_s15 }
   0x3   :  { %p1229_p0 = scmp.ne.s32.totalorder %s16_s15, %s1228_s16  ;;  %p1234_p2 = scmp.lt.s32.totalorder %s1228_s16, %s1228_s16 }
   0x5   :  { %p1235_p3 = por %p1234_p2, %p1233_p1 }
   0x7   :  { %p1236_p4 = pnand %p1235_p3, %p1229_p0 }
   0x9   :  { %1239 = shalt.err (!%p1236_p4)  }
   0xa   :  { %s1282_s17 = smov [#allocation5]  }
   0xb   :  { %18 = dma.vmem_to_smem %s16_s15, 16, %s1282_s17, [#allocation4] }
   0xc   :  { %1260 = dma.done.wait [#allocation4], 16 }
   0xd   :  { %1261 = vsyncadd [#allocation4], 4294967280 }
   0xe   :  { %20 = sfence }
   0xf   :  { %s1346_s18 = smov 0   ;;  %s1348_s19 = smov 0  }
  0x10   :  { %s1350_s20 = smov 0   ;;  %s1352_s0 = smov 0  }
  0x11   :  { %s1354_s21 = smov 0  }
  0x12 LB: > { %s38_s22 = sadd.s32 1, %s1272_s20  ;;  %s45_s23 = sadd.s32 1, %s1276_s0  ;;  %s1280_s21 = sphi %s1354_s21, %s26_s21   ;;  %s1276_s0 = sphi %s1352_s0, %s1540_s0   ;;  %s1272_s20 = sphi %s1350_s20, %s1539_s20   ;;  %s1268_s19 = sphi %s1348_s19, %s1538_s19   ;;  %s1264_s18 = sphi %s1346_s18, %s1537_s18  }
  0x13   : > { %p39_p5 = scmp.ge.s32.totalorder %s38_s22, 4  ;;  %p1034_p6 = scmp.ge.s32.totalorder %s1280_s21, 1 }
  0x14   : > { %p339_p7 = scmp.lt.s32.totalorder %s1280_s21, 9 }
  0x15   : > { %s1542_s22 = smov (%p39_p5, %s38_s22), 0  ;;  %s1544_s23 = smov (!%p39_p5, %s45_s23), %s1276_s0 }
  0x16   : > { %p340_p8 = pnand %p1034_p6, %p339_p7  ;;  %p47_p9 = scmp.ge.s32.totalorder %s1544_s23, 2 }
  0x17   : > { %p393_p10 = scmp.lt.s32.totalorder (!%p340_p8), %s1268_s19, 1  ;;  %p1041_p11 = scmp.ne.s32.totalorder (!%p340_p8), %s1264_s18, 0 }
  0x18   : > { %s1546_s23 = smov (%p47_p9, %s1544_s23), 0  ;;  %343 = sbr.rel (%p340_p8) target bundleno = 761 (0x2f9), region = 56 }
  0x1f   : > { %s394_s24 = scalar_select %p393_p10, %s1268_s19, 1 }
  0x20   : > { %426 = sbr.rel (%p1041_p11) target bundleno = 39 (0x27), region = 60  ;;  %vm431_vm0 = vcmask (!%p1041_p11), 261120   ;;  %v1283_v3 = vmov (!%p1041_p11), 0.0  }
  0x21   : > { %s1382_s25 = sshll.u32 %s394_s24, 3  ;;  %434 = vst.msk [vmem:[#allocation3] sm:$0xff] (!%p1041_p11), %vm431_vm0, %v1283_v3  ;;  %435 = vst.msk [vmem:[#allocation3 + $0x8] sm:$0xff] (!%p1041_p11), %vm431_vm0, %v1283_v3 }
  0x22   : > { %s400_s28 = scalar_lea.vmem %s1527_s1, %s1382_s25  ;;  %s410_s11 = scalar_lea.vmem %s1528_s2, %s1382_s25 }
  0x23   : > { %s1396_s14 = scalar_lea.vmem %s1536_s10, %s1382_s25  ;;  %v1090_v0 = vld [vmem:[%s400_s28] sm:$0xff] (!%p1041_p11)  }
  0x24   : > { %v1091_v1 = vunpack.c.l.bf16 (!%p1041_p11), %v1090_v0  ;;  %v1092_v2 = vunpack.c.h.bf16 (!%p1041_p11), %v1090_v0 }
  0x26   : > { %432 = vst.msk [vmem:[#allocation2] sm:$0xff] (!%p1041_p11), %vm431_vm0, %v1091_v1  ;;  %433 = vst.msk [vmem:[#allocation2 + $0x8] sm:$0xff] (!%p1041_p11), %vm431_vm0, %v1092_v2 }
  0x27 PF: > { %s1400_s15 = sshll.u32 %s1264_s18, 4  ;;  %s1083_s16 = smul.u32 12, %s1264_s18  ;;  %v1284_v4 = vmov 0.0   ;;  %vm1285_vm1 = vmmov 0   ;;  %vm512_vm2 = vcmask 1043456   ;;  %vm569_vm3 = vcmask 261120  }
  0x28   : > { %1119 = vmatprep.subr.bf16.mxu1 %v1284_v4  ;;  %1111 = vmatprep.subr.bf16.mxu0 %v1284_v4  ;;  %s460_s26 = scalar_lea.vmem %s1529_s3, %s1400_s15  ;;  %s483_s29 = scalar_lea.vmem %s1533_s7, %s1400_s15  ;;  %v1209_v17 = vld [vmem:[%s410_s11] sm:$0xff]   ;;  %vm508_vm4 = vcmask 195584   ;;  %v437_v25 = vlaneseq }
  0x29   : > { %v1413_v5 = vld [vmem:[%s483_s29] sm:$0xf]  ;;  %s473_s13 = scalar_lea.vmem %s1531_s5, %s1083_s16  ;;  %1123 = vmatprep.mubr.msk.bf16.mxu1 %vm1285_vm1, %v1284_v4  ;;  %1115 = vmatprep.mubr.msk.bf16.mxu0 %vm1285_vm1, %v1284_v4  ;;  %v1422_v6 = vld [vmem:[%s483_s29 + $0x4] sm:$0xf]  ;;  %v1424_v7 = vld [vmem:[%s483_s29 + $0x8] sm:$0xf]  ;;  %s466_s27 = scalar_lea.vmem %s1530_s4, %s1400_s15 }
  0x2a   : > { %v1426_v8 = vld [vmem:[%s483_s29 + $0xc] sm:$0xf]  ;;  %v1205_v9 = vld [vmem:[%s460_s26] sm:$0xff]   ;;  %v1208_v14 = vld [vmem:[%s473_s13 + $0x8] ss:$0 sps:$4 sm:$0xff]   ;;  %s478_s29 = scalar_lea.vmem %s1532_s6, %s1083_s16  ;;  %s489_s16 = scalar_lea.vmem %s1534_s8, %s1400_s15  ;;  %v1471_v26 = vshrl.u32 %v437_v25, 7 }
  0x2b   : > { %v1206_v12 = vld [vmem:[%s473_s13] sm:$0xff]   ;;  %1120 = vmatpush3.bf16.msra.mxu1 %v1205_v9  ;;  %v1207_v13 = vld [vmem:[%s460_s26 + $0x8] sm:$0xff]   ;;  %v514_v15 = vsel %vm512_vm2, %v1208_v14, 0  ;;  %s1044_s13 = sshll.u32 %s1264_s18, 2  ;;  %s436_s15 = sld [smem:[#allocation5 + %s1268_s19]] }
  0x2c   : > { %1112 = vmatpush3.bf16.msra.mxu0 %v1206_v12  ;;  %1121 = vmatprep.subr.bf16.mxu1 %v1284_v4  ;;  %v1210_v18 = vld [vmem:[%s466_s27] sm:$0xff]   ;;  %v1213_v20 = vld [vmem:[%s478_s29 + $0x8] ss:$0 sps:$4 sm:$0xff]   ;;  %v755_v27 = vsub.s32 3, %v1471_v26  ;;  %v728_v40 = vsub.s32 1, %v1471_v26  ;;  %v616_v55 = vsub.s32 0, %v1471_v26 }
  0x2d   : > { %v1428_v10 = vld [vmem:[#allocation2] sm:$0xff]  ;;  %v1430_v11 = vld [vmem:[#allocation2 + $0x8] sm:$0xff]  ;;  %1113 = vmatprep.subr.bf16.mxu0 %v1284_v4  ;;  %v630_v22 = vsel %vm512_vm2, %v1213_v20, 0  ;;  %v439_v0 = vadd.s32 8, %v1471_v26  ;;  %p1069_p12 = scmp.ge.s32.totalorder %s1264_s18, 3 }
  0x2e   : > { %v456_v16 = vpack.c.bf16 %v1430_v11, %v1428_v10  ;;  %v1211_v19 = vld [vmem:[%s478_s29] sm:$0xff]   ;;  %v1212_v21 = vld [vmem:[%s466_s27 + $0x8] sm:$0xff]   ;;  %s452_s27 = scalar_lea.vmem %s1535_s9, %s1044_s13  ;;  %vm1287_vm7 = vmmov (!%p1069_p12), 0  }
  0x2f   : > { %1122 = vmatpush3.bf16.msra.mxu1 %v1207_v13  ;;  %v1214_v23 = vld [vmem:[%s489_s16] sm:$0xff]   ;;  %v1215_v24 = vld [vmem:[%s489_s16 + $0x8] sm:$0xff]  }
  0x30   : > { %1114 = vmatpush3.bf16.msra.mxu0 %v514_v15  ;;  %1135 = vmatprep.subr.bf16.mxu1 %v1284_v4  ;;  %v1477_v28 = vld [vmem:[%s452_s27] sm:$0xf] }
  0x31   : > { %1127 = vmatprep.subr.bf16.mxu0 %v1284_v4  ;;  %v1480_v29 = vrot.slane %v1477_v28, %v755_v27  ;;  %v729_v42 = vrot.slane %v1477_v28, %v728_v40  ;;  %v617_v57 = vrot.slane %v1477_v28, %v616_v55  ;;  %v444_v1 = vstv %s436_s15 }
  0x32   : > { %1124 = vmatmul.mubr.msk.bf16.vlgmr.msra.gmra.mrb[0].mxu1 %vm569_vm3, %v456_v16  ;;  %vm445_vm5 = vcmp.lt.s32.totalorder %v1471_v26, %v444_v1  ;;  %vm446_vm6 = vcmp.lt.s32.totalorder %v439_v0, %v444_v1 }
  0x33   : > { %1116 = vmatmul.mubr.msk.bf16.vlgmr.msra.gmra.mrb[0].mxu0 %vm508_vm4, %v1209_v17  ;;  %1136 = vmatpush3.bf16.msra.mxu1 %v1210_v18  ;;  %v1042_v14 = vsel %vm445_vm5, 1.0, %v1284_v4  ;;  %v1043_v15 = vsel %vm446_vm6, 1.0, %v1284_v4 }
  0x34   : > { %1128 = vmatpush3.bf16.msra.mxu0 %v1211_v19  ;;  %1137 = vmatprep.subr.bf16.mxu1 %v1284_v4 }
  0x35   : > { %1129 = vmatprep.subr.bf16.mxu0 %v1284_v4  ;;  %1139 = vmatprep.mubr.msk.bf16.mxu1 %vm1285_vm1, %v1284_v4 }
  0x36   : > { %1131 = vmatprep.mubr.msk.bf16.mxu0 %vm1285_vm1, %v1284_v4 }
  0x37   : > { %1138 = vmatpush3.bf16.msra.mxu1 %v1212_v21 }
  0x38   : > { %1130 = vmatpush3.bf16.msra.mxu0 %v630_v22 }
  0x39   : > { %1143 = vmatprep.subr.bf16.mxu0 %v1284_v4 }
  0x3a   : > { %1140 = vmatmul.mubr.msk.bf16.vlgmr.msra.gmra.mrb[4].mxu1 %vm569_vm3, %v456_v16 }
  0x3b   : > { %1132 = vmatmul.mubr.msk.bf16.vlgmr.msra.gmra.mrb[4].mxu0 %vm508_vm4, %v1209_v17 }
  0x3c   : > { %1147 = vmatprep.mubr.msk.bf16.mxu0 %vm1285_vm1, %v1284_v4  ;;  %1144 = vmatpush3.bf16.msra.mxu0 %v1214_v23  ;;  %v751_v23 = vld [vmem:[#allocation3] sm:$0xff] }
  0x3d   : > { %1145 = vmatprep.subr.bf16.mxu0 %v1284_v4 }
  0x40   : > { %1146 = vmatpush3.bf16.msra.mxu0 %v1215_v24 }
 0x105   : > { %v607_v30 = vpop.f32.mrb[0].mxu1 }
 0x106   : > { %v550_v31 = vpop.f32.mrb[0].mxu0  ;;  %v1125_v32 = vpop.f32.mrb[1].mxu1 }
 0x107   : > { %v608_v33 = vadd.f32 %v607_v30, %v550_v31  ;;  %v1117_v34 = vpop.f32.mrb[1].mxu0  ;;  %v610_v35 = vpop.f32.mrb[2].mxu1  ;;  %v752_v31 = vld [vmem:[#allocation3 + $0x8] sm:$0xff] }
 0x108   : > { %v553_v36 = vpop.f32.mrb[2].mxu0  ;;  %v1126_v37 = vpop.f32.mrb[3].mxu1  ;;  %v1070_v34 = vcombine.low (!%p1069_p12), %v1413_v5, %v1422_v6 }
 0x109   : > { %v611_v38 = vadd.f32 %v610_v35, %v553_v36  ;;  %v1118_v39 = vpop.f32.mrb[3].mxu0  ;;  %v618_v58 = vadd.f32 %v617_v57, %v608_v33  ;;  %v1286_v35 = vmov (!%p1069_p12), 0.0   ;;  %v825_v36 = vsub.s32 (!%p1069_p12), 2, %v1471_v26 }
 0x10a   : > { %1151 = vmatprep.subr.bf16.mxu0 (!%p1069_p12), %v1286_v35 }
 0x10b   : > { %v619_v60 = vadd.f32 %v617_v57, %v611_v38  ;;  %v826_v37 = vrot.slane (!%p1069_p12), %v1477_v28, %v825_v36 }
 0x10d   : > { %v719_v41 = vpop.f32.mrb[4].mxu1 }
 0x10e   : > { %v666_v43 = vpop.f32.mrb[4].mxu0  ;;  %v1141_v44 = vpop.f32.mrb[5].mxu1 }
 0x10f   : > { %v720_v45 = vadd.f32 %v719_v41, %v666_v43  ;;  %v1133_v46 = vpop.f32.mrb[5].mxu0  ;;  %v722_v47 = vpop.f32.mrb[6].mxu1 }
 0x110   : > { %v669_v48 = vpop.f32.mrb[6].mxu0  ;;  %v1142_v49 = vpop.f32.mrb[7].mxu1 }
 0x111   : > { %v730_v50 = vadd.f32 %v729_v42, %v720_v45  ;;  %v723_v51 = vadd.f32 %v722_v47, %v669_v48  ;;  %v1134_v52 = vpop.f32.mrb[7].mxu0 }
 0x113   : > { %v1064_v53 = vmul.f32 -1.442695, %v730_v50  ;;  %v731_v54 = vadd.f32 %v729_v42, %v723_v51 }
 0x115   : > { %1216 = vpow2.f32 %v1064_v53  ;;  %v1065_v56 = vmul.f32 -1.442695, %v731_v54 }
 0x117   : > { %1218 = vpow2.f32 %v1065_v56 }
 0x118   : > { %1220 = vtanh.f32 %v618_v58 }
 0x11f   : > { %v1217_v59 = vpop.eup %1216 }
 0x120   : > { %v740_v61 = vadd.f32 1.0, %v1217_v59 }
 0x121   : > { %v1219_v62 = vpop.eup %1218 }
 0x122   : > { %1222 = vrcp.f32 %v740_v61  ;;  %v741_v63 = vadd.f32 1.0, %v1219_v62  ;;  %v1221_v2 = vpop.eup %1220 }
 0x123   : > { %1224 = vtanh.f32 %v619_v60 }
 0x124   : > { %1226 = vrcp.f32 %v741_v63 }
 0x12c   : > { %v1223_v3 = vpop.eup %1222 }
 0x12d   : > { %v1225_v9 = vpop.eup %1224  ;;  %v746_v12 = vmul.f32 %v1223_v3, %v1221_v2 }
 0x12e   : > { %v1227_v13 = vpop.eup %1226 }
 0x12f   : > { %v747_v16 = vmul.f32 %v1227_v13, %v1225_v9  ;;  %v748_v17 = vmul.f32 %v1042_v14, %v746_v12 }
 0x131   : > { %v749_v18 = vmul.f32 %v1043_v15, %v747_v16 }
 0x133   : > { %v750_v19 = vpack.c.bf16 %v749_v18, %v748_v17 }
 0x135   : > { %1148 = vmatmul.mubr.msk.bf16.vlgmr.msra.gmra.mrb[8].mxu0 %vm569_vm3, %v750_v19 }
 0x136   : > { %1155 = vmatprep.mubr.msk.bf16.mxu0 (!%p1069_p12), %vm1287_vm7, %v1286_v35  ;;  %1152 = vmatpush3.bf16.msra.mxu0 (!%p1069_p12), %v1070_v34 }
 0x137   : > { %1153 = vmatprep.subr.bf16.mxu0 (!%p1069_p12), %v1286_v35 }
 0x208   : > { %v806_v20 = vpop.f32.mrb[8].mxu0 }
 0x209   : > { %v807_v21 = vadd.f32 %v806_v20, %v1480_v29  ;;  %v1149_v22 = vpop.f32.mrb[9].mxu0 }
 0x20a   : > { %v809_v24 = vpop.f32.mrb[10].mxu0 }
 0x20b   : > { %v813_v25 = vmul.f32 %v1042_v14, %v807_v21  ;;  %v810_v27 = vadd.f32 %v809_v24, %v1480_v29  ;;  %v1150_v30 = vpop.f32.mrb[11].mxu0  ;;  %822 = sbr.rel (%p1069_p12) target bundleno = 751 (0x2ef), region = 64  ;;  %v1071_v29 = vcombine.low (!%p1069_p12), %v1424_v7, %v1426_v8 }
 0x20d   : > { %v815_v32 = vadd.f32 %v813_v25, %v751_v23  ;;  %v814_v33 = vmul.f32 %v1043_v15, %v810_v27  ;;  %1154 = vmatpush3.bf16.msra.mxu0 (!%p1069_p12), %v1071_v29 }
 0x20f   : > { %817 = vst.msk [vmem:[#allocation3] sm:$0xff] %vm569_vm3, %v815_v32  ;;  %v816_v4 = vadd.f32 %v814_v33, %v752_v31 }
 0x210   : > { %1156 = vmatmul.mubr.msk.bf16.vlgmr.msra.gmra.mrb[0].mxu0 (!%p1069_p12), %vm569_vm3, %v750_v19 }
 0x211   : > { %818 = vst.msk [vmem:[#allocation3 + $0x8] sm:$0xff] %vm569_vm3, %v816_v4 }
 0x2e3   : > { %v873_v38 = vpop.f32.mrb[0].mxu0 }
 0x2e4   : > { %v874_v39 = vadd.f32 %v873_v38, %v826_v37  ;;  %v1157_v40 = vpop.f32.mrb[1].mxu0 }
 0x2e5   : > { %v876_v5 = vpop.f32.mrb[2].mxu0 }
 0x2e6   : > { %v880_v6 = vmul.f32 %v1042_v14, %v874_v39  ;;  %v877_v41 = vadd.f32 %v876_v5, %v826_v37  ;;  %v1158_v42 = vpop.f32.mrb[3].mxu0 }
 0x2e8   : > { %v882_v43 = vadd.f32 %v880_v6, %v1428_v10  ;;  %v881_v44 = vmul.f32 %v1043_v15, %v877_v41 }
 0x2ea   : > { %v884_v45 = vmul.f32 1.4142135, %v882_v43  ;;  %v883_v7 = vadd.f32 %v881_v44, %v1430_v11 }
 0x2ec   : > { %886 = vst.msk [vmem:[#allocation2] sm:$0xff] %vm569_vm3, %v884_v45  ;;  %v885_v8 = vmul.f32 1.4142135, %v883_v7 }
 0x2ee   : > { %887 = vst.msk [vmem:[#allocation2 + $0x8] sm:$0xff] %vm569_vm3, %v885_v8 }
 0x2ef PF: > { %p1073_p13 = scmp.ne.s32.totalorder %s1264_s18, 3 }
 0x2f0   : > { %vm902_vm8 = vcmask (!%p1073_p13), 257024  }
 0x2f1   : > { %891 = sbr.rel (%p1073_p13) target bundleno = 761 (0x2f9), region = 68 }
 0x2f3   : > { %v892_v26 = vld [vmem:[#allocation3] sm:$0xff] (!%p1073_p13) }
 0x2f4   : > { %v1087_v46 = vpack.c.bf16 (!%p1073_p13), %v892_v26, %v892_v26 }
 0x2f5   : > { %v893_v28 = vld [vmem:[#allocation3 + $0x8] sm:$0xff] (!%p1073_p13) }
 0x2f6   : > { %v1088_v10 = vpack.c.bf16 (!%p1073_p13), %v893_v28, %v893_v28  ;;  %903 = vst.msk [vmem:[%s1396_s14] sm:$0xf] (!%p1073_p13), %vm902_vm8, %v1087_v46 }
 0x2f8   : > { %904 = vst.msk [vmem:[%s1396_s14 + $0x4] sm:$0xf] %vm902_vm8, %v1088_v10 }
 0x2f9 PF: > { %s26_s21 = sadd.s32 1, %s1280_s21   ;;  %s1537_s18 = smov %s1272_s20 }
 0x2fa   : > { %p23_p0 = scmp.ge.s32.totalorder %s26_s21, 10   ;;  %s1538_s19 = smov %s1276_s0 }
 0x2fb   : > { %s1539_s20 = smov %s1542_s22  ;;  %s1540_s0 = smov %s1546_s23 }
 0x2fc   :  { %25 = sbr.rel (!%p23_p0) target bundleno = 18 (0x12), region = 108 }

</bundles_post_ra>
